<compile_context>
chip_gen: v5e
topology: v5e:2x2
jax: 0.10.0
libtpu: 0.0.40
codegen_flags: <defaults>
</compile_context>

<pallas_src>
import math
import functools

import jax
import jax.numpy as jnp
from jax import lax
from jax.experimental import pallas as pl
from jax.experimental.pallas import tpu as pltpu

D_MODEL = 128
N_HEAD = 4
FFN_HIDDEN = 256
EPS = 1e-12


def _layernorm(y, g_ref, b_ref):
    # Matches PyTorch LayerNorm (unbiased=False, eps inside sqrt).
    mean = jnp.mean(y, axis=-1, keepdims=True)
    var = jnp.mean(jnp.square(y - mean), axis=-1, keepdims=True)
    out = (y - mean) * lax.rsqrt(var + EPS)          # rsqrt -> EUP slot
    return g_ref[...] * out + b_ref[...]


def encoder_layer_kernel(x_ref, mask_ref,
                         wqkv_ref, bqkv_ref, wc_ref, bc_ref,
                         g1_ref, be1_ref,
                         w1_ref, b1_ref, w2_ref, b2_ref,
                         g2_ref, be2_ref,
                         o_ref,
                         qkv_ref, acc_ref,
                         *, n_head):
    Bb, L, D = x_ref.shape
    dh = D // n_head
    M = Bb * L

    # ---- Fused QKV projection: one [M,128] x [128,384] bf16 MXU pass ------
    rows_bf = x_ref[...].astype(jnp.bfloat16).reshape(M, D)
    qkv = jnp.dot(rows_bf, wqkv_ref[...],
                  preferred_element_type=jnp.float32) + bqkv_ref[...]
    # Stage QKV in VMEM (bf16) so the head loop reads slices from a ref
    # instead of holding three [M,128] register values live. Fully rewritten
    # every grid step, so no stale data can leak across steps.
    qkv_ref[...] = qkv.astype(jnp.bfloat16)

    # Mask: select (masked_fill) semantics, exactly like the reference.
    keep = mask_ref[...].astype(jnp.float32).reshape(Bb, L, L) != 0.0

    # ---- Multi-head attention, output projection folded into the loop -----
    for h in range(n_head):
        h_sl = slice(h * dh, (h + 1) * dh)
        qh = qkv_ref[:, h_sl].reshape(Bb, L, dh)                  # scale folded in Wq
        kh = qkv_ref[:, slice(D + h * dh, D + (h + 1) * dh)].reshape(Bb, L, dh)
        vh = qkv_ref[:, slice(2 * D + h * dh, 2 * D + (h + 1) * dh)].reshape(Bb, L, dh)

        s = jnp.einsum('bld,bmd->blm', qh, kh,
                       preferred_element_type=jnp.float32)        # [Bb, L, L]
        s = jnp.where(keep, s, -10000.0)
        s = s - jnp.max(s, axis=-1, keepdims=True)
        p = jnp.exp(s)
        p = p * pl.reciprocal(jnp.sum(p, axis=-1, keepdims=True), approx=True)
        ctx = jnp.einsum('blm,bmd->bld', p.astype(jnp.bfloat16), vh,
                         preferred_element_type=jnp.float32)      # [Bb, L, dh]

        # Fold the concat + w_concat projection: accumulate ctx_h @ Wc_h into a
        # lane-dense (128-wide) f32 VMEM accumulator -> no 32-lane masked stores.
        contrib = jnp.dot(ctx.reshape(M, dh).astype(jnp.bfloat16),
                          wc_ref[h_sl, :], preferred_element_type=jnp.float32)
        if h == 0:
            acc_ref[...] = contrib          # init every grid step (no staleness)
        else:
            acc_ref[...] += contrib

    # TODO(synk): dropout layers implemented as identity (eval-mode semantics).
    # ---- Residual + LayerNorm 1 --------------------------------------------
    rows_f32 = x_ref[...].reshape(M, D).astype(jnp.float32)
    attn = acc_ref[...] + bc_ref[...]
    x1 = _layernorm(attn + rows_f32, g1_ref, be1_ref)             # [M, D]

    # ---- Position-wise FFN (bf16 operands, f32 accumulation) ---------------
    h1 = jnp.maximum(
        jnp.dot(x1.astype(jnp.bfloat16), w1_ref[...],
                preferred_element_type=jnp.float32) + b1_ref[...],
        0.0)
    h2 = jnp.dot(h1.astype(jnp.bfloat16), w2_ref[...],
                 preferred_element_type=jnp.float32) + b2_ref[...]

    # ---- Residual + LayerNorm 2 ---------------------------------------------
    x2 = _layernorm(h2 + x1, g2_ref, be2_ref)
    o_ref[...] = x2.reshape(Bb, L, D).astype(o_ref.dtype)


def make_params(key, d_model=D_MODEL, ffn_hidden=FFN_HIDDEN):
    ks = jax.random.split(key, 8)
    s = 0.02
    return dict(
        wq=jax.random.normal(ks[0], (d_model, d_model), jnp.float32) * s,
        bq=jnp.zeros((1, d_model), jnp.float32),
        wk=jax.random.normal(ks[1], (d_model, d_model), jnp.float32) * s,
        bk=jnp.zeros((1, d_model), jnp.float32),
        wv=jax.random.normal(ks[2], (d_model, d_model), jnp.float32) * s,
        bv=jnp.zeros((1, d_model), jnp.float32),
        wc=jax.random.normal(ks[3], (d_model, d_model), jnp.float32) * s,
        bc=jnp.zeros((1, d_model), jnp.float32),
        g1=jnp.ones((1, d_model), jnp.float32),
        be1=jnp.zeros((1, d_model), jnp.float32),
        w1=jax.random.normal(ks[4], (ffn_hidden, d_model), jnp.float32) * s,
        b1=jax.random.normal(ks[5], (1, ffn_hidden), jnp.float32) * s,
        w2=jax.random.normal(ks[6], (d_model, ffn_hidden), jnp.float32) * s,
        b2=jax.random.normal(ks[7], (1, d_model), jnp.float32) * s,
        g2=jnp.ones((1, d_model), jnp.float32),
        be2=jnp.zeros((1, d_model), jnp.float32),
    )


PREPPED_ORDER = ["wqkv", "bqkv", "wc", "bc", "g1", "be1",
                 "w1", "b1", "w2", "b2", "g2", "be2"]


def prepare_params(params, n_head=N_HEAD, matmul_dtype=jnp.bfloat16):
    """One-time parameter prep (hoisted out of every forward call):
    transpose nn.Linear weights to [in, out], fold 1/sqrt(dh) into wq/bq,
    fuse QKV into one [D, 3D] weight, cast matmul weights to bf16."""
    d_model = params["wq"].shape[0]
    dh = d_model // n_head
    scale = 1.0 / math.sqrt(dh)
    wqkv = jnp.concatenate(
        [params["wq"].T * scale, params["wk"].T, params["wv"].T], axis=1)
    bqkv = jnp.concatenate(
        [params["bq"] * scale, params["bk"], params["bv"]], axis=1)
    return dict(
        wqkv=wqkv.astype(matmul_dtype),
        bqkv=bqkv.astype(jnp.float32),
        wc=params["wc"].T.astype(matmul_dtype),
        bc=params["bc"].astype(jnp.float32),
        g1=params["g1"].astype(jnp.float32),
        be1=params["be1"].astype(jnp.float32),
        w1=params["w1"].T.astype(matmul_dtype),
        b1=params["b1"].astype(jnp.float32),
        w2=params["w2"].T.astype(matmul_dtype),
        b2=params["b2"].astype(jnp.float32),
        g2=params["g2"].astype(jnp.float32),
        be2=params["be2"].astype(jnp.float32),
    )


def _vmem_limit_bytes():
    # v5e/v6e: 128 MiB physical VMEM; v7x: 64 MiB. Leave headroom.
    try:
        cap = int(pltpu.get_tpu_info().vmem_capacity_bytes)
    except Exception:
        cap = 64 * 1024 * 1024
    return int(min(max(cap - 16 * 1024 * 1024, 32 * 1024 * 1024),
                   96 * 1024 * 1024))


def _choose_block_b(B, L, vmem_budget):
    """Pick the batch-block size: target >=256 flattened rows per grid step
    (fills MXU M-dim, amortizes ~0.35us/step overhead). Only split the batch
    into multiple grid steps when each step still carries that much work
    (splitting tiny steps across v7x TCs loses more than it gains, and the
    grid is a serial loop on v5e/v6e anyway). Bounded by a rough VMEM budget."""
    target_rows = 256
    per_b = L * (24 * D_MODEL + 10 * FFN_HIDDEN + 24 * L) + 4096  # rough bytes
    max_by_vmem = max(1, (vmem_budget // 2) // per_b)
    want = max(1, min(B, -(-target_rows // L), max_by_vmem))
    for bb in range(int(want), 0, -1):
        if B % bb == 0:
            return bb
    return 1


def encoder_layer(x, src_mask, prepped, *, block_b=None, n_head=N_HEAD):
    B, L, D = x.shape
    vmem_limit = _vmem_limit_bytes()
    if block_b is None:
        block_b = _choose_block_b(B, L, vmem_limit)
    assert B % block_b == 0, "block_b must divide batch size"
    grid = (B // block_b,)
    M = block_b * L

    args = [prepped[name] for name in PREPPED_ORDER]

    def full_spec(shape):
        # Constant index_map: parameter blocks stay resident across grid steps.
        nd = len(shape)
        return pl.BlockSpec(shape, lambda b, _nd=nd: (0,) * _nd)

    in_specs = [
        pl.BlockSpec((block_b, L, D), lambda b: (b, 0, 0)),           # x block
        pl.BlockSpec((block_b, 1, L, L), lambda b: (b, 0, 0, 0)),     # int8 mask
    ] + [full_spec(tuple(a.shape)) for a in args]

    out_spec = pl.BlockSpec((block_b, L, D), lambda b: (b, 0, 0))

    kernel = functools.partial(encoder_layer_kernel, n_head=n_head)
    return pl.pallas_call(
        kernel,
        out_shape=jax.ShapeDtypeStruct((B, L, D), x.dtype),
        grid_spec=pltpu.PrefetchScalarGridSpec(
            num_scalar_prefetch=0,
            grid=grid,
            in_specs=in_specs,
            out_specs=out_spec,
            scratch_shapes=[
                pltpu.VMEM((M, 3 * D), jnp.bfloat16),   # staged QKV slab
                pltpu.VMEM((M, D), jnp.float32),        # attn-output accumulator
            ],
        ),
        compiler_params=pltpu.CompilerParams(
            dimension_semantics=("parallel",),
            vmem_limit_bytes=vmem_limit,
        ),
    )(x, src_mask, *args)


def encoder_layer_ref(x, src_mask, params):
    """Pure-JAX f32 reference matching the PyTorch EncoderLayer (eval mode)."""
    B, L, D = x.shape
    dh = D // N_HEAD

    def lin(t, w, b):
        return t @ w.T + b[0]

    def ln(t, g, b):
        mean = jnp.mean(t, axis=-1, keepdims=True)
        var = jnp.mean((t - mean) ** 2, axis=-1, keepdims=True)
        return g[0] * ((t - mean) / jnp.sqrt(var + EPS)) + b[0]

    q = lin(x, params["wq"], params["bq"])
    k = lin(x, params["wk"], params["bk"])
    v = lin(x, params["wv"], params["bv"])

    def split(t):
        return t.reshape(B, L, N_HEAD, dh).transpose(0, 2, 1, 3)

    qh, kh, vh = split(q), split(k), split(v)
    score = jnp.einsum("bhld,bhmd->bhlm", qh, kh) / math.sqrt(dh)
    score = jnp.where(src_mask == 0, -10000.0, score)
    score = jax.nn.softmax(score, axis=-1)
    out = jnp.einsum("bhlm,bhmd->bhld", score, vh)
    out = out.transpose(0, 2, 1, 3).reshape(B, L, D)
    out = lin(out, params["wc"], params["bc"])

    x1 = ln(out + x, params["g1"], params["be1"])
    h = jnp.maximum(lin(x1, params["w1"], params["b1"]), 0.0)
    h = lin(h, params["w2"], params["b2"])
    return ln(h + x1, params["g2"], params["be2"])


if __name__ == "__main__":
    key = jax.random.PRNGKey(0)
    k_param, k_x, k_mask = jax.random.split(key, 3)

    B, L = 2, 8
    x = jax.random.normal(k_x, (B, L, D_MODEL), jnp.float32)
    # 0/1 keep-mask, broadcast over heads: [B, 1, L, L], int8 (4x less DMA).
    src_mask = (jax.random.uniform(k_mask, (B, 1, L, L)) > 0.2).astype(jnp.int8)

    params = make_params(k_param)
    prepped = prepare_params(params)   # one-time transpose / fuse / bf16 cast

    out = encoder_layer(x, src_mask, prepped)
    out = jax.block_until_ready(out)

    ref = encoder_layer_ref(x, src_mask, params)
    assert out.shape == (B, L, D_MODEL)
    # bf16 MXU operands + approx reciprocal -> looser tolerance vs f32 reference.
    assert jnp.allclose(out, ref, atol=2e-2, rtol=2e-2), "mismatch vs reference"

    print("KERNEL_OK")
</pallas_src>

<mosaic_0001>
module attributes {stable_mosaic.version = 11 : i64} {
  func.func @encoder_layer_kernel(%arg0: i32, %arg1: memref<2x8x128xf32, #tpu.memory_space<vmem>>, %arg2: memref<2x1x8x8xi8, #tpu.memory_space<vmem>>, %arg3: memref<128x384xbf16, #tpu.memory_space<vmem>>, %arg4: memref<1x384xf32, #tpu.memory_space<vmem>>, %arg5: memref<128x128xbf16, #tpu.memory_space<vmem>>, %arg6: memref<1x128xf32, #tpu.memory_space<vmem>>, %arg7: memref<1x128xf32, #tpu.memory_space<vmem>>, %arg8: memref<1x128xf32, #tpu.memory_space<vmem>>, %arg9: memref<128x256xbf16, #tpu.memory_space<vmem>>, %arg10: memref<1x256xf32, #tpu.memory_space<vmem>>, %arg11: memref<256x128xbf16, #tpu.memory_space<vmem>>, %arg12: memref<1x128xf32, #tpu.memory_space<vmem>>, %arg13: memref<1x128xf32, #tpu.memory_space<vmem>>, %arg14: memref<1x128xf32, #tpu.memory_space<vmem>>, %arg15: memref<2x8x128xf32, #tpu.memory_space<vmem>>, %arg16: memref<16x384xbf16, #tpu.memory_space<vmem>>, %arg17: memref<16x128xf32, #tpu.memory_space<vmem>>) attributes {dimension_semantics = [#tpu.dimension_semantics<parallel>], iteration_bounds = array<i64: 1>, scalar_prefetch = 0 : i64, scratch_operands = 2 : i64, tpu.core_type = #tpu.core_type<tc>, window_params = [{transform_indices = @transform_0, window_bounds = array<i64: 2, 8, 128>}, {transform_indices = @transform_1, window_bounds = array<i64: 2, 1, 8, 8>}, {pipeline_mode = #tpu.pipeline_mode<synchronous>, transform_indices = @transform_2, window_bounds = array<i64: 128, 384>}, {pipeline_mode = #tpu.pipeline_mode<synchronous>, transform_indices = @transform_3, window_bounds = array<i64: 1, 384>}, {pipeline_mode = #tpu.pipeline_mode<synchronous>, transform_indices = @transform_4, window_bounds = array<i64: 128, 128>}, {pipeline_mode = #tpu.pipeline_mode<synchronous>, transform_indices = @transform_5, window_bounds = array<i64: 1, 128>}, {pipeline_mode = #tpu.pipeline_mode<synchronous>, transform_indices = @transform_6, window_bounds = array<i64: 1, 128>}, {pipeline_mode = #tpu.pipeline_mode<synchronous>, transform_indices = @transform_7, window_bounds = array<i64: 1, 128>}, {pipeline_mode = #tpu.pipeline_mode<synchronous>, transform_indices = @transform_8, window_bounds = array<i64: 128, 256>}, {pipeline_mode = #tpu.pipeline_mode<synchronous>, transform_indices = @transform_9, window_bounds = array<i64: 1, 256>}, {pipeline_mode = #tpu.pipeline_mode<synchronous>, transform_indices = @transform_10, window_bounds = array<i64: 256, 128>}, {pipeline_mode = #tpu.pipeline_mode<synchronous>, transform_indices = @transform_11, window_bounds = array<i64: 1, 128>}, {pipeline_mode = #tpu.pipeline_mode<synchronous>, transform_indices = @transform_12, window_bounds = array<i64: 1, 128>}, {pipeline_mode = #tpu.pipeline_mode<synchronous>, transform_indices = @transform_13, window_bounds = array<i64: 1, 128>}, {transform_indices = @transform_14, window_bounds = array<i64: 2, 8, 128>}]} {
    %c0 = arith.constant 0 : index
    %c0_0 = arith.constant 0 : index
    %c0_1 = arith.constant 0 : index
    %0 = vector.load %arg1[%c0, %c0_0, %c0_1] : memref<2x8x128xf32, #tpu.memory_space<vmem>>, vector<2x8x128xf32>
    %1 = arith.truncf %0 : vector<2x8x128xf32> to vector<2x8x128xbf16>
    %2 = vector.shape_cast %1 : vector<2x8x128xbf16> to vector<16x128xbf16>
    %c0_2 = arith.constant 0 : index
    %c0_3 = arith.constant 0 : index
    %3 = vector.load %arg3[%c0_2, %c0_3] : memref<128x384xbf16, #tpu.memory_space<vmem>>, vector<128x384xbf16>
    %cst = arith.constant dense<0.000000e+00> : vector<16x384xf32>
    %4 = tpu.matmul %2, %3, %cst {dimension_numbers = #tpu.dot_dimension_numbers<[1], [0], [0], [1], [0, 0, 1, 1], [], []>} : vector<16x128xbf16>, vector<128x384xbf16>, vector<16x384xf32> -> vector<16x384xf32>
    %c0_4 = arith.constant 0 : index
    %c0_5 = arith.constant 0 : index
    %5 = vector.load %arg4[%c0_4, %c0_5] : memref<1x384xf32, #tpu.memory_space<vmem>>, vector<1x384xf32>
    %6 = vector.broadcast %5 : vector<1x384xf32> to vector<16x384xf32>
    %7 = arith.addf %4, %6 : vector<16x384xf32>
    %8 = arith.truncf %7 : vector<16x384xf32> to vector<16x384xbf16>
    %c0_6 = arith.constant 0 : index
    %c0_7 = arith.constant 0 : index
    %9 = vector.load %arg16[%c0_6, %c0_7] : memref<16x384xbf16, #tpu.memory_space<vmem>>, vector<16x384xbf16>
    tpu.vector_store %arg16[%c0_6, %c0_7], %8 {strides = array<i32>} : memref<16x384xbf16, #tpu.memory_space<vmem>>, vector<16x384xbf16>,
    %c0_8 = arith.constant 0 : index
    %c0_9 = arith.constant 0 : index
    %c0_10 = arith.constant 0 : index
    %c0_11 = arith.constant 0 : index
    %10 = vector.load %arg2[%c0_8, %c0_9, %c0_10, %c0_11] : memref<2x1x8x8xi8, #tpu.memory_space<vmem>>, vector<2x1x8x8xi8>
    %11 = arith.sitofp %10 : vector<2x1x8x8xi8> to vector<2x1x8x8xf32>
    %12 = vector.shape_cast %11 : vector<2x1x8x8xf32> to vector<2x8x8xf32>
    %cst_12 = arith.constant 0.000000e+00 : f32
    %13 = vector.broadcast %cst_12 : f32 to vector<2x8x8xf32>
    %14 = arith.cmpf one, %12, %13 : vector<2x8x8xf32>
    %c0_13 = arith.constant 0 : index
    %c0_14 = arith.constant 0 : index
    %15 = vector.load %arg16[%c0_13, %c0_14] : memref<16x384xbf16, #tpu.memory_space<vmem>>, vector<16x32xbf16>
    %16 = vector.shape_cast %15 : vector<16x32xbf16> to vector<2x8x32xbf16>
    %c0_15 = arith.constant 0 : index
    %c128 = arith.constant 128 : index
    %17 = vector.load %arg16[%c0_15, %c128] : memref<16x384xbf16, #tpu.memory_space<vmem>>, vector<16x32xbf16>
    %18 = vector.shape_cast %17 : vector<16x32xbf16> to vector<2x8x32xbf16>
    %c0_16 = arith.constant 0 : index
    %c256 = arith.constant 256 : index
    %19 = vector.load %arg16[%c0_16, %c256] : memref<16x384xbf16, #tpu.memory_space<vmem>>, vector<16x32xbf16>
    %20 = vector.shape_cast %19 : vector<16x32xbf16> to vector<2x8x32xbf16>
    "tpu.trace_start"() <{level = 10 : i32, message = "bld,bmd->blm"}> : () -> ()
    %cst_17 = arith.constant dense<0.000000e+00> : vector<2x8x8xf32>
    %21 = tpu.matmul %16, %18, %cst_17 {dimension_numbers = #tpu.dot_dimension_numbers<[2], [2], [1], [1], [0, 0, 0, 1, 1, 1], [0], [0]>} : vector<2x8x32xbf16>, vector<2x8x32xbf16>, vector<2x8x8xf32> -> vector<2x8x8xf32>
    %cst_18 = arith.constant -1.000000e+04 : f32
    "tpu.trace_stop"() : () -> ()
    %22 = vector.broadcast %cst_18 : f32 to vector<2x8x8xf32>
    %23 = arith.select %14, %21, %22 : vector<2x8x8xi1>, vector<2x8x8xf32>
    %cst_19 = arith.constant dense<0xFF800000> : vector<2x8xf32>
    %24 = vector.multi_reduction <maximumf>, %23, %cst_19 [2] : vector<2x8x8xf32> to vector<2x8xf32>
    %25 = vector.shape_cast %24 : vector<2x8xf32> to vector<2x8x1xf32>
    %26 = vector.broadcast %25 : vector<2x8x1xf32> to vector<2x8x8xf32>
    %27 = arith.subf %23, %26 : vector<2x8x8xf32>
    %28 = math.exp %27 : vector<2x8x8xf32>
    %cst_20 = arith.constant dense<0.000000e+00> : vector<2x8xf32>
    %29 = vector.multi_reduction <add>, %28, %cst_20 [2] : vector<2x8x8xf32> to vector<2x8xf32>
    %30 = vector.shape_cast %29 : vector<2x8xf32> to vector<2x8x1xf32>
    %31 = tpu.reciprocal %30 {approx = true} : vector<2x8x1xf32> -> vector<2x8x1xf32>
    %32 = vector.broadcast %31 : vector<2x8x1xf32> to vector<2x8x8xf32>
    %33 = arith.mulf %28, %32 : vector<2x8x8xf32>
    %34 = arith.truncf %33 : vector<2x8x8xf32> to vector<2x8x8xbf16>
    "tpu.trace_start"() <{level = 10 : i32, message = "blm,bmd->bld"}> : () -> ()
    %cst_21 = arith.constant dense<0.000000e+00> : vector<2x8x32xf32>
    %35 = tpu.matmul %34, %20, %cst_21 {dimension_numbers = #tpu.dot_dimension_numbers<[2], [1], [1], [2], [0, 0, 0, 1, 1, 2], [0], [0]>} : vector<2x8x8xbf16>, vector<2x8x32xbf16>, vector<2x8x32xf32> -> vector<2x8x32xf32>
    "tpu.trace_stop"() : () -> ()
    %36 = vector.shape_cast %35 : vector<2x8x32xf32> to vector<16x32xf32>
    %37 = arith.truncf %36 : vector<16x32xf32> to vector<16x32xbf16>
    %c0_22 = arith.constant 0 : index
    %c0_23 = arith.constant 0 : index
    %38 = vector.load %arg5[%c0_22, %c0_23] : memref<128x128xbf16, #tpu.memory_space<vmem>>, vector<32x128xbf16>
    %cst_24 = arith.constant dense<0.000000e+00> : vector<16x128xf32>
    %39 = tpu.matmul %37, %38, %cst_24 {dimension_numbers = #tpu.dot_dimension_numbers<[1], [0], [0], [1], [0, 0, 1, 1], [], []>} : vector<16x32xbf16>, vector<32x128xbf16>, vector<16x128xf32> -> vector<16x128xf32>
    %c0_25 = arith.constant 0 : index
    %c0_26 = arith.constant 0 : index
    %40 = vector.load %arg17[%c0_25, %c0_26] : memref<16x128xf32, #tpu.memory_space<vmem>>, vector<16x128xf32>
    tpu.vector_store %arg17[%c0_25, %c0_26], %39 {strides = array<i32>} : memref<16x128xf32, #tpu.memory_space<vmem>>, vector<16x128xf32>,
    %c0_27 = arith.constant 0 : index
    %c32 = arith.constant 32 : index
    %41 = vector.load %arg16[%c0_27, %c32] : memref<16x384xbf16, #tpu.memory_space<vmem>>, vector<16x32xbf16>
    %42 = vector.shape_cast %41 : vector<16x32xbf16> to vector<2x8x32xbf16>
    %c0_28 = arith.constant 0 : index
    %c160 = arith.constant 160 : index
    %43 = vector.load %arg16[%c0_28, %c160] : memref<16x384xbf16, #tpu.memory_space<vmem>>, vector<16x32xbf16>
    %44 = vector.shape_cast %43 : vector<16x32xbf16> to vector<2x8x32xbf16>
    %c0_29 = arith.constant 0 : index
    %c288 = arith.constant 288 : index
    %45 = vector.load %arg16[%c0_29, %c288] : memref<16x384xbf16, #tpu.memory_space<vmem>>, vector<16x32xbf16>
    %46 = vector.shape_cast %45 : vector<16x32xbf16> to vector<2x8x32xbf16>
    "tpu.trace_start"() <{level = 10 : i32, message = "bld,bmd->blm"}> : () -> ()
    %cst_30 = arith.constant dense<0.000000e+00> : vector<2x8x8xf32>
    %47 = tpu.matmul %42, %44, %cst_30 {dimension_numbers = #tpu.dot_dimension_numbers<[2], [2], [1], [1], [0, 0, 0, 1, 1, 1], [0], [0]>} : vector<2x8x32xbf16>, vector<2x8x32xbf16>, vector<2x8x8xf32> -> vector<2x8x8xf32>
    %cst_31 = arith.constant -1.000000e+04 : f32
    "tpu.trace_stop"() : () -> ()
    %48 = vector.broadcast %cst_31 : f32 to vector<2x8x8xf32>
    %49 = arith.select %14, %47, %48 : vector<2x8x8xi1>, vector<2x8x8xf32>
    %cst_32 = arith.constant dense<0xFF800000> : vector<2x8xf32>
    %50 = vector.multi_reduction <maximumf>, %49, %cst_32 [2] : vector<2x8x8xf32> to vector<2x8xf32>
    %51 = vector.shape_cast %50 : vector<2x8xf32> to vector<2x8x1xf32>
    %52 = vector.broadcast %51 : vector<2x8x1xf32> to vector<2x8x8xf32>
    %53 = arith.subf %49, %52 : vector<2x8x8xf32>
    %54 = math.exp %53 : vector<2x8x8xf32>
    %cst_33 = arith.constant dense<0.000000e+00> : vector<2x8xf32>
    %55 = vector.multi_reduction <add>, %54, %cst_33 [2] : vector<2x8x8xf32> to vector<2x8xf32>
    %56 = vector.shape_cast %55 : vector<2x8xf32> to vector<2x8x1xf32>
    %57 = tpu.reciprocal %56 {approx = true} : vector<2x8x1xf32> -> vector<2x8x1xf32>
    %58 = vector.broadcast %57 : vector<2x8x1xf32> to vector<2x8x8xf32>
    %59 = arith.mulf %54, %58 : vector<2x8x8xf32>
    %60 = arith.truncf %59 : vector<2x8x8xf32> to vector<2x8x8xbf16>
    "tpu.trace_start"() <{level = 10 : i32, message = "blm,bmd->bld"}> : () -> ()
    %cst_34 = arith.constant dense<0.000000e+00> : vector<2x8x32xf32>
    %61 = tpu.matmul %60, %46, %cst_34 {dimension_numbers = #tpu.dot_dimension_numbers<[2], [1], [1], [2], [0, 0, 0, 1, 1, 2], [0], [0]>} : vector<2x8x8xbf16>, vector<2x8x32xbf16>, vector<2x8x32xf32> -> vector<2x8x32xf32>
    "tpu.trace_stop"() : () -> ()
    %62 = vector.shape_cast %61 : vector<2x8x32xf32> to vector<16x32xf32>
    %63 = arith.truncf %62 : vector<16x32xf32> to vector<16x32xbf16>
    %c32_35 = arith.constant 32 : index
    %c0_36 = arith.constant 0 : index
    %64 = vector.load %arg5[%c32_35, %c0_36] : memref<128x128xbf16, #tpu.memory_space<vmem>>, vector<32x128xbf16>
    %cst_37 = arith.constant dense<0.000000e+00> : vector<16x128xf32>
    %65 = tpu.matmul %63, %64, %cst_37 {dimension_numbers = #tpu.dot_dimension_numbers<[1], [0], [0], [1], [0, 0, 1, 1], [], []>} : vector<16x32xbf16>, vector<32x128xbf16>, vector<16x128xf32> -> vector<16x128xf32>
    %c0_38 = arith.constant 0 : index
    %c0_39 = arith.constant 0 : index
    %66 = vector.load %arg17[%c0_38, %c0_39] : memref<16x128xf32, #tpu.memory_space<vmem>>, vector<16x128xf32>
    %67 = arith.addf %66, %65 : vector<16x128xf32>
    %c0_40 = arith.constant 0 : index
    %c0_41 = arith.constant 0 : index
    %68 = vector.load %arg17[%c0_40, %c0_41] : memref<16x128xf32, #tpu.memory_space<vmem>>, vector<16x128xf32>
    tpu.vector_store %arg17[%c0_40, %c0_41], %67 {strides = array<i32>} : memref<16x128xf32, #tpu.memory_space<vmem>>, vector<16x128xf32>,
    %c0_42 = arith.constant 0 : index
    %c64 = arith.constant 64 : index
    %69 = vector.load %arg16[%c0_42, %c64] : memref<16x384xbf16, #tpu.memory_space<vmem>>, vector<16x32xbf16>
    %70 = vector.shape_cast %69 : vector<16x32xbf16> to vector<2x8x32xbf16>
    %c0_43 = arith.constant 0 : index
    %c192 = arith.constant 192 : index
    %71 = vector.load %arg16[%c0_43, %c192] : memref<16x384xbf16, #tpu.memory_space<vmem>>, vector<16x32xbf16>
    %72 = vector.shape_cast %71 : vector<16x32xbf16> to vector<2x8x32xbf16>
    %c0_44 = arith.constant 0 : index
    %c320 = arith.constant 320 : index
    %73 = vector.load %arg16[%c0_44, %c320] : memref<16x384xbf16, #tpu.memory_space<vmem>>, vector<16x32xbf16>
    %74 = vector.shape_cast %73 : vector<16x32xbf16> to vector<2x8x32xbf16>
    "tpu.trace_start"() <{level = 10 : i32, message = "bld,bmd->blm"}> : () -> ()
    %cst_45 = arith.constant dense<0.000000e+00> : vector<2x8x8xf32>
    %75 = tpu.matmul %70, %72, %cst_45 {dimension_numbers = #tpu.dot_dimension_numbers<[2], [2], [1], [1], [0, 0, 0, 1, 1, 1], [0], [0]>} : vector<2x8x32xbf16>, vector<2x8x32xbf16>, vector<2x8x8xf32> -> vector<2x8x8xf32>
    %cst_46 = arith.constant -1.000000e+04 : f32
    "tpu.trace_stop"() : () -> ()
    %76 = vector.broadcast %cst_46 : f32 to vector<2x8x8xf32>
    %77 = arith.select %14, %75, %76 : vector<2x8x8xi1>, vector<2x8x8xf32>
    %cst_47 = arith.constant dense<0xFF800000> : vector<2x8xf32>
    %78 = vector.multi_reduction <maximumf>, %77, %cst_47 [2] : vector<2x8x8xf32> to vector<2x8xf32>
    %79 = vector.shape_cast %78 : vector<2x8xf32> to vector<2x8x1xf32>
    %80 = vector.broadcast %79 : vector<2x8x1xf32> to vector<2x8x8xf32>
    %81 = arith.subf %77, %80 : vector<2x8x8xf32>
    %82 = math.exp %81 : vector<2x8x8xf32>
    %cst_48 = arith.constant dense<0.000000e+00> : vector<2x8xf32>
    %83 = vector.multi_reduction <add>, %82, %cst_48 [2] : vector<2x8x8xf32> to vector<2x8xf32>
    %84 = vector.shape_cast %83 : vector<2x8xf32> to vector<2x8x1xf32>
    %85 = tpu.reciprocal %84 {approx = true} : vector<2x8x1xf32> -> vector<2x8x1xf32>
    %86 = vector.broadcast %85 : vector<2x8x1xf32> to vector<2x8x8xf32>
    %87 = arith.mulf %82, %86 : vector<2x8x8xf32>
    %88 = arith.truncf %87 : vector<2x8x8xf32> to vector<2x8x8xbf16>
    "tpu.trace_start"() <{level = 10 : i32, message = "blm,bmd->bld"}> : () -> ()
    %cst_49 = arith.constant dense<0.000000e+00> : vector<2x8x32xf32>
    %89 = tpu.matmul %88, %74, %cst_49 {dimension_numbers = #tpu.dot_dimension_numbers<[2], [1], [1], [2], [0, 0, 0, 1, 1, 2], [0], [0]>} : vector<2x8x8xbf16>, vector<2x8x32xbf16>, vector<2x8x32xf32> -> vector<2x8x32xf32>
    "tpu.trace_stop"() : () -> ()
    %90 = vector.shape_cast %89 : vector<2x8x32xf32> to vector<16x32xf32>
    %91 = arith.truncf %90 : vector<16x32xf32> to vector<16x32xbf16>
    %c64_50 = arith.constant 64 : index
    %c0_51 = arith.constant 0 : index
    %92 = vector.load %arg5[%c64_50, %c0_51] : memref<128x128xbf16, #tpu.memory_space<vmem>>, vector<32x128xbf16>
    %cst_52 = arith.constant dense<0.000000e+00> : vector<16x128xf32>
    %93 = tpu.matmul %91, %92, %cst_52 {dimension_numbers = #tpu.dot_dimension_numbers<[1], [0], [0], [1], [0, 0, 1, 1], [], []>} : vector<16x32xbf16>, vector<32x128xbf16>, vector<16x128xf32> -> vector<16x128xf32>
    %c0_53 = arith.constant 0 : index
    %c0_54 = arith.constant 0 : index
    %94 = vector.load %arg17[%c0_53, %c0_54] : memref<16x128xf32, #tpu.memory_space<vmem>>, vector<16x128xf32>
    %95 = arith.addf %94, %93 : vector<16x128xf32>
    %c0_55 = arith.constant 0 : index
    %c0_56 = arith.constant 0 : index
    %96 = vector.load %arg17[%c0_55, %c0_56] : memref<16x128xf32, #tpu.memory_space<vmem>>, vector<16x128xf32>
    tpu.vector_store %arg17[%c0_55, %c0_56], %95 {strides = array<i32>} : memref<16x128xf32, #tpu.memory_space<vmem>>, vector<16x128xf32>,
    %c0_57 = arith.constant 0 : index
    %c96 = arith.constant 96 : index
    %97 = vector.load %arg16[%c0_57, %c96] : memref<16x384xbf16, #tpu.memory_space<vmem>>, vector<16x32xbf16>
    %98 = vector.shape_cast %97 : vector<16x32xbf16> to vector<2x8x32xbf16>
    %c0_58 = arith.constant 0 : index
    %c224 = arith.constant 224 : index
    %99 = vector.load %arg16[%c0_58, %c224] : memref<16x384xbf16, #tpu.memory_space<vmem>>, vector<16x32xbf16>
    %100 = vector.shape_cast %99 : vector<16x32xbf16> to vector<2x8x32xbf16>
    %c0_59 = arith.constant 0 : index
    %c352 = arith.constant 352 : index
    %101 = vector.load %arg16[%c0_59, %c352] : memref<16x384xbf16, #tpu.memory_space<vmem>>, vector<16x32xbf16>
    %102 = vector.shape_cast %101 : vector<16x32xbf16> to vector<2x8x32xbf16>
    "tpu.trace_start"() <{level = 10 : i32, message = "bld,bmd->blm"}> : () -> ()
    %cst_60 = arith.constant dense<0.000000e+00> : vector<2x8x8xf32>
    %103 = tpu.matmul %98, %100, %cst_60 {dimension_numbers = #tpu.dot_dimension_numbers<[2], [2], [1], [1], [0, 0, 0, 1, 1, 1], [0], [0]>} : vector<2x8x32xbf16>, vector<2x8x32xbf16>, vector<2x8x8xf32> -> vector<2x8x8xf32>
    %cst_61 = arith.constant -1.000000e+04 : f32
    "tpu.trace_stop"() : () -> ()
    %104 = vector.broadcast %cst_61 : f32 to vector<2x8x8xf32>
    %105 = arith.select %14, %103, %104 : vector<2x8x8xi1>, vector<2x8x8xf32>
    %cst_62 = arith.constant dense<0xFF800000> : vector<2x8xf32>
    %106 = vector.multi_reduction <maximumf>, %105, %cst_62 [2] : vector<2x8x8xf32> to vector<2x8xf32>
    %107 = vector.shape_cast %106 : vector<2x8xf32> to vector<2x8x1xf32>
    %108 = vector.broadcast %107 : vector<2x8x1xf32> to vector<2x8x8xf32>
    %109 = arith.subf %105, %108 : vector<2x8x8xf32>
    %110 = math.exp %109 : vector<2x8x8xf32>
    %cst_63 = arith.constant dense<0.000000e+00> : vector<2x8xf32>
    %111 = vector.multi_reduction <add>, %110, %cst_63 [2] : vector<2x8x8xf32> to vector<2x8xf32>
    %112 = vector.shape_cast %111 : vector<2x8xf32> to vector<2x8x1xf32>
    %113 = tpu.reciprocal %112 {approx = true} : vector<2x8x1xf32> -> vector<2x8x1xf32>
    %114 = vector.broadcast %113 : vector<2x8x1xf32> to vector<2x8x8xf32>
    %115 = arith.mulf %110, %114 : vector<2x8x8xf32>
    %116 = arith.truncf %115 : vector<2x8x8xf32> to vector<2x8x8xbf16>
    "tpu.trace_start"() <{level = 10 : i32, message = "blm,bmd->bld"}> : () -> ()
    %cst_64 = arith.constant dense<0.000000e+00> : vector<2x8x32xf32>
    %117 = tpu.matmul %116, %102, %cst_64 {dimension_numbers = #tpu.dot_dimension_numbers<[2], [1], [1], [2], [0, 0, 0, 1, 1, 2], [0], [0]>} : vector<2x8x8xbf16>, vector<2x8x32xbf16>, vector<2x8x32xf32> -> vector<2x8x32xf32>
    "tpu.trace_stop"() : () -> ()
    %118 = vector.shape_cast %117 : vector<2x8x32xf32> to vector<16x32xf32>
    %119 = arith.truncf %118 : vector<16x32xf32> to vector<16x32xbf16>
    %c96_65 = arith.constant 96 : index
    %c0_66 = arith.constant 0 : index
    %120 = vector.load %arg5[%c96_65, %c0_66] : memref<128x128xbf16, #tpu.memory_space<vmem>>, vector<32x128xbf16>
    %cst_67 = arith.constant dense<0.000000e+00> : vector<16x128xf32>
    %121 = tpu.matmul %119, %120, %cst_67 {dimension_numbers = #tpu.dot_dimension_numbers<[1], [0], [0], [1], [0, 0, 1, 1], [], []>} : vector<16x32xbf16>, vector<32x128xbf16>, vector<16x128xf32> -> vector<16x128xf32>
    %c0_68 = arith.constant 0 : index
    %c0_69 = arith.constant 0 : index
    %122 = vector.load %arg17[%c0_68, %c0_69] : memref<16x128xf32, #tpu.memory_space<vmem>>, vector<16x128xf32>
    %123 = arith.addf %122, %121 : vector<16x128xf32>
    %c0_70 = arith.constant 0 : index
    %c0_71 = arith.constant 0 : index
    %124 = vector.load %arg17[%c0_70, %c0_71] : memref<16x128xf32, #tpu.memory_space<vmem>>, vector<16x128xf32>
    tpu.vector_store %arg17[%c0_70, %c0_71], %123 {strides = array<i32>} : memref<16x128xf32, #tpu.memory_space<vmem>>, vector<16x128xf32>,
    %c0_72 = arith.constant 0 : index
    %c0_73 = arith.constant 0 : index
    %c0_74 = arith.constant 0 : index
    %125 = vector.load %arg1[%c0_72, %c0_73, %c0_74] : memref<2x8x128xf32, #tpu.memory_space<vmem>>, vector<2x8x128xf32>
    %126 = vector.shape_cast %125 : vector<2x8x128xf32> to vector<16x128xf32>
    %c0_75 = arith.constant 0 : index
    %c0_76 = arith.constant 0 : index
    %127 = vector.load %arg17[%c0_75, %c0_76] : memref<16x128xf32, #tpu.memory_space<vmem>>, vector<16x128xf32>
    %c0_77 = arith.constant 0 : index
    %c0_78 = arith.constant 0 : index
    %128 = vector.load %arg6[%c0_77, %c0_78] : memref<1x128xf32, #tpu.memory_space<vmem>>, vector<1x128xf32>
    %129 = vector.broadcast %128 : vector<1x128xf32> to vector<16x128xf32>
    %130 = arith.addf %127, %129 : vector<16x128xf32>
    %131 = arith.addf %130, %126 : vector<16x128xf32>
    %cst_79 = arith.constant dense<0.000000e+00> : vector<16xf32>
    %132 = vector.multi_reduction <add>, %131, %cst_79 [1] : vector<16x128xf32> to vector<16xf32>
    %133 = vector.shape_cast %132 : vector<16xf32> to vector<16x1xf32>
    %cst_80 = arith.constant 1.280000e+02 : f32
    %134 = vector.broadcast %cst_80 : f32 to vector<16x1xf32>
    %135 = arith.divf %133, %134 : vector<16x1xf32>
    %136 = vector.broadcast %135 : vector<16x1xf32> to vector<16x128xf32>
    %137 = arith.subf %131, %136 : vector<16x128xf32>
    %138 = arith.mulf %137, %137 : vector<16x128xf32>
    %cst_81 = arith.constant dense<0.000000e+00> : vector<16xf32>
    %139 = vector.multi_reduction <add>, %138, %cst_81 [1] : vector<16x128xf32> to vector<16xf32>
    %140 = vector.shape_cast %139 : vector<16xf32> to vector<16x1xf32>
    %cst_82 = arith.constant 1.280000e+02 : f32
    %141 = vector.broadcast %cst_82 : f32 to vector<16x1xf32>
    %142 = arith.divf %140, %141 : vector<16x1xf32>
    %143 = vector.broadcast %135 : vector<16x1xf32> to vector<16x128xf32>
    %144 = arith.subf %131, %143 : vector<16x128xf32>
    %cst_83 = arith.constant 9.99999996E-13 : f32
    %145 = vector.broadcast %cst_83 : f32 to vector<16x1xf32>
    %146 = arith.addf %142, %145 : vector<16x1xf32>
    %147 = math.rsqrt %146 : vector<16x1xf32>
    %148 = vector.broadcast %147 : vector<16x1xf32> to vector<16x128xf32>
    %149 = arith.mulf %144, %148 : vector<16x128xf32>
    %c0_84 = arith.constant 0 : index
    %c0_85 = arith.constant 0 : index
    %150 = vector.load %arg7[%c0_84, %c0_85] : memref<1x128xf32, #tpu.memory_space<vmem>>, vector<1x128xf32>
    %151 = vector.broadcast %150 : vector<1x128xf32> to vector<16x128xf32>
    %152 = arith.mulf %151, %149 : vector<16x128xf32>
    %c0_86 = arith.constant 0 : index
    %c0_87 = arith.constant 0 : index
    %153 = vector.load %arg8[%c0_86, %c0_87] : memref<1x128xf32, #tpu.memory_space<vmem>>, vector<1x128xf32>
    %154 = vector.broadcast %153 : vector<1x128xf32> to vector<16x128xf32>
    %155 = arith.addf %152, %154 : vector<16x128xf32>
    %156 = arith.truncf %155 : vector<16x128xf32> to vector<16x128xbf16>
    %c0_88 = arith.constant 0 : index
    %c0_89 = arith.constant 0 : index
    %157 = vector.load %arg9[%c0_88, %c0_89] : memref<128x256xbf16, #tpu.memory_space<vmem>>, vector<128x256xbf16>
    %cst_90 = arith.constant dense<0.000000e+00> : vector<16x256xf32>
    %158 = tpu.matmul %156, %157, %cst_90 {dimension_numbers = #tpu.dot_dimension_numbers<[1], [0], [0], [1], [0, 0, 1, 1], [], []>} : vector<16x128xbf16>, vector<128x256xbf16>, vector<16x256xf32> -> vector<16x256xf32>
    %c0_91 = arith.constant 0 : index
    %c0_92 = arith.constant 0 : index
    %159 = vector.load %arg10[%c0_91, %c0_92] : memref<1x256xf32, #tpu.memory_space<vmem>>, vector<1x256xf32>
    %160 = vector.broadcast %159 : vector<1x256xf32> to vector<16x256xf32>
    %161 = arith.addf %158, %160 : vector<16x256xf32>
    %cst_93 = arith.constant 0.000000e+00 : f32
    %162 = vector.broadcast %cst_93 : f32 to vector<16x256xf32>
    %163 = arith.maximumf %161, %162 : vector<16x256xf32>
    %164 = arith.truncf %163 : vector<16x256xf32> to vector<16x256xbf16>
    %c0_94 = arith.constant 0 : index
    %c0_95 = arith.constant 0 : index
    %165 = vector.load %arg11[%c0_94, %c0_95] : memref<256x128xbf16, #tpu.memory_space<vmem>>, vector<256x128xbf16>
    %cst_96 = arith.constant dense<0.000000e+00> : vector<16x128xf32>
    %166 = tpu.matmul %164, %165, %cst_96 {dimension_numbers = #tpu.dot_dimension_numbers<[1], [0], [0], [1], [0, 0, 1, 1], [], []>} : vector<16x256xbf16>, vector<256x128xbf16>, vector<16x128xf32> -> vector<16x128xf32>
    %c0_97 = arith.constant 0 : index
    %c0_98 = arith.constant 0 : index
    %167 = vector.load %arg12[%c0_97, %c0_98] : memref<1x128xf32, #tpu.memory_space<vmem>>, vector<1x128xf32>
    %168 = vector.broadcast %167 : vector<1x128xf32> to vector<16x128xf32>
    %169 = arith.addf %166, %168 : vector<16x128xf32>
    %170 = arith.addf %169, %155 : vector<16x128xf32>
    %cst_99 = arith.constant dense<0.000000e+00> : vector<16xf32>
    %171 = vector.multi_reduction <add>, %170, %cst_99 [1] : vector<16x128xf32> to vector<16xf32>
    %172 = vector.shape_cast %171 : vector<16xf32> to vector<16x1xf32>
    %cst_100 = arith.constant 1.280000e+02 : f32
    %173 = vector.broadcast %cst_100 : f32 to vector<16x1xf32>
    %174 = arith.divf %172, %173 : vector<16x1xf32>
    %175 = vector.broadcast %174 : vector<16x1xf32> to vector<16x128xf32>
    %176 = arith.subf %170, %175 : vector<16x128xf32>
    %177 = arith.mulf %176, %176 : vector<16x128xf32>
    %cst_101 = arith.constant dense<0.000000e+00> : vector<16xf32>
    %178 = vector.multi_reduction <add>, %177, %cst_101 [1] : vector<16x128xf32> to vector<16xf32>
    %179 = vector.shape_cast %178 : vector<16xf32> to vector<16x1xf32>
    %cst_102 = arith.constant 1.280000e+02 : f32
    %180 = vector.broadcast %cst_102 : f32 to vector<16x1xf32>
    %181 = arith.divf %179, %180 : vector<16x1xf32>
    %182 = vector.broadcast %174 : vector<16x1xf32> to vector<16x128xf32>
    %183 = arith.subf %170, %182 : vector<16x128xf32>
    %cst_103 = arith.constant 9.99999996E-13 : f32
    %184 = vector.broadcast %cst_103 : f32 to vector<16x1xf32>
    %185 = arith.addf %181, %184 : vector<16x1xf32>
    %186 = math.rsqrt %185 : vector<16x1xf32>
    %187 = vector.broadcast %186 : vector<16x1xf32> to vector<16x128xf32>
    %188 = arith.mulf %183, %187 : vector<16x128xf32>
    %c0_104 = arith.constant 0 : index
    %c0_105 = arith.constant 0 : index
    %189 = vector.load %arg13[%c0_104, %c0_105] : memref<1x128xf32, #tpu.memory_space<vmem>>, vector<1x128xf32>
    %190 = vector.broadcast %189 : vector<1x128xf32> to vector<16x128xf32>
    %191 = arith.mulf %190, %188 : vector<16x128xf32>
    %c0_106 = arith.constant 0 : index
    %c0_107 = arith.constant 0 : index
    %192 = vector.load %arg14[%c0_106, %c0_107] : memref<1x128xf32, #tpu.memory_space<vmem>>, vector<1x128xf32>
    %193 = vector.broadcast %192 : vector<1x128xf32> to vector<16x128xf32>
    %194 = arith.addf %191, %193 : vector<16x128xf32>
    %195 = vector.shape_cast %194 : vector<16x128xf32> to vector<2x8x128xf32>
    %c0_108 = arith.constant 0 : index
    %c0_109 = arith.constant 0 : index
    %c0_110 = arith.constant 0 : index
    %196 = vector.load %arg15[%c0_108, %c0_109, %c0_110] : memref<2x8x128xf32, #tpu.memory_space<vmem>>, vector<2x8x128xf32>
    tpu.vector_store %arg15[%c0_108, %c0_109, %c0_110], %195 {strides = array<i32>} : memref<2x8x128xf32, #tpu.memory_space<vmem>>, vector<2x8x128xf32>,
    return
  }
  func.func @transform_0(%arg0: i32) -> (i32, i32, i32) {
    %c0_i32 = arith.constant 0 : i32
    %c0_i32_0 = arith.constant 0 : i32
    %c0_i32_1 = arith.constant 0 : i32
    return %arg0, %c0_i32, %c0_i32_0 : i32, i32, i32
  }
  func.func @transform_1(%arg0: i32) -> (i32, i32, i32, i32) {
    %c0_i32 = arith.constant 0 : i32
    %c0_i32_0 = arith.constant 0 : i32
    %c0_i32_1 = arith.constant 0 : i32
    %c0_i32_2 = arith.constant 0 : i32
    return %arg0, %c0_i32, %c0_i32_0, %c0_i32_1 : i32, i32, i32, i32
  }
  func.func @transform_2(%arg0: i32) -> (i32, i32) {
    %c0_i32 = arith.constant 0 : i32
    %c0_i32_0 = arith.constant 0 : i32
    %c0_i32_1 = arith.constant 0 : i32
    return %c0_i32, %c0_i32_0 : i32, i32
  }
  func.func @transform_3(%arg0: i32) -> (i32, i32) {
    %c0_i32 = arith.constant 0 : i32
    %c0_i32_0 = arith.constant 0 : i32
    %c0_i32_1 = arith.constant 0 : i32
    return %c0_i32, %c0_i32_0 : i32, i32
  }
  func.func @transform_4(%arg0: i32) -> (i32, i32) {
    %c0_i32 = arith.constant 0 : i32
    %c0_i32_0 = arith.constant 0 : i32
    %c0_i32_1 = arith.constant 0 : i32
    return %c0_i32, %c0_i32_0 : i32, i32
  }
  func.func @transform_5(%arg0: i32) -> (i32, i32) {
    %c0_i32 = arith.constant 0 : i32
    %c0_i32_0 = arith.constant 0 : i32
    %c0_i32_1 = arith.constant 0 : i32
    return %c0_i32, %c0_i32_0 : i32, i32
  }
  func.func @transform_6(%arg0: i32) -> (i32, i32) {
    %c0_i32 = arith.constant 0 : i32
    %c0_i32_0 = arith.constant 0 : i32
    %c0_i32_1 = arith.constant 0 : i32
    return %c0_i32, %c0_i32_0 : i32, i32
  }
  func.func @transform_7(%arg0: i32) -> (i32, i32) {
    %c0_i32 = arith.constant 0 : i32
    %c0_i32_0 = arith.constant 0 : i32
    %c0_i32_1 = arith.constant 0 : i32
    return %c0_i32, %c0_i32_0 : i32, i32
  }
  func.func @transform_8(%arg0: i32) -> (i32, i32) {
    %c0_i32 = arith.constant 0 : i32
    %c0_i32_0 = arith.constant 0 : i32
    %c0_i32_1 = arith.constant 0 : i32
    return %c0_i32, %c0_i32_0 : i32, i32
  }
  func.func @transform_9(%arg0: i32) -> (i32, i32) {
    %c0_i32 = arith.constant 0 : i32
    %c0_i32_0 = arith.constant 0 : i32
    %c0_i32_1 = arith.constant 0 : i32
    return %c0_i32, %c0_i32_0 : i32, i32
  }
  func.func @transform_10(%arg0: i32) -> (i32, i32) {
    %c0_i32 = arith.constant 0 : i32
    %c0_i32_0 = arith.constant 0 : i32
    %c0_i32_1 = arith.constant 0 : i32
    return %c0_i32, %c0_i32_0 : i32, i32
  }
  func.func @transform_11(%arg0: i32) -> (i32, i32) {
    %c0_i32 = arith.constant 0 : i32
    %c0_i32_0 = arith.constant 0 : i32
    %c0_i32_1 = arith.constant 0 : i32
    return %c0_i32, %c0_i32_0 : i32, i32
  }
  func.func @transform_12(%arg0: i32) -> (i32, i32) {
    %c0_i32 = arith.constant 0 : i32
    %c0_i32_0 = arith.constant 0 : i32
    %c0_i32_1 = arith.constant 0 : i32
    return %c0_i32, %c0_i32_0 : i32, i32
  }
  func.func @transform_13(%arg0: i32) -> (i32, i32) {
    %c0_i32 = arith.constant 0 : i32
    %c0_i32_0 = arith.constant 0 : i32
    %c0_i32_1 = arith.constant 0 : i32
    return %c0_i32, %c0_i32_0 : i32, i32
  }
  func.func @transform_14(%arg0: i32) -> (i32, i32, i32) {
    %c0_i32 = arith.constant 0 : i32
    %c0_i32_0 = arith.constant 0 : i32
    %c0_i32_1 = arith.constant 0 : i32
    return %arg0, %c0_i32, %c0_i32_0 : i32, i32, i32
  }
}

</mosaic_0001>

<bundles_post_ra>
// kernel: tpu_custom_call.1
= control target key start
LH: loop header
LB: loop body
LE: loop exit
PB: predicated region body
PF: predicated region fallthrough
CT: control target
= control target key end

     0   :  { %19 = vsyncpa [#allocation5], 0  ;;  %s2488_s0 = inlined_call_operand.hbm [shape: f32[2,8,128], index: 0, kind: input, shape index: {}]   ;;  %s2489_s1 = inlined_call_operand.hbm [shape: s8[2,1,8,8], index: 1, kind: input, shape index: {}]   ;;  %s2490_s2 = inlined_call_operand.hbm [shape: bf16[128,384], index: 2, kind: input, shape index: {}]   ;;  %s2491_s3 = inlined_call_operand.hbm [shape: f32[1,384], index: 3, kind: input, shape index: {}]   ;;  %s2492_s4 = inlined_call_operand.hbm [shape: bf16[128,128], index: 4, kind: input, shape index: {}]   ;;  %s2493_s5 = inlined_call_operand.vmem [shape: f32[1,128], index: 5, kind: input, shape index: {}]   ;;  %s2494_s6 = inlined_call_operand.vmem [shape: f32[1,128], index: 6, kind: input, shape index: {}]   ;;  %s2495_s7 = inlined_call_operand.vmem [shape: f32[1,128], index: 7, kind: input, shape index: {}]   ;;  %s2496_s8 = inlined_call_operand.hbm [shape: bf16[128,256], index: 8, kind: input, shape index: {}]   ;;  %s2497_s9 = inlined_call_operand.vmem [shape: f32[1,256], index: 9, kind: input, shape index: {}]   ;;  %s2498_s10 = inlined_call_operand.hbm [shape: bf16[256,128], index: 10, kind: input, shape index: {}]   ;;  %s2499_s11 = inlined_call_operand.vmem [shape: f32[1,128], index: 11, kind: input, shape index: {}]   ;;  %s2500_s12 = inlined_call_operand.vmem [shape: f32[1,128], index: 12, kind: input, shape index: {}]   ;;  %s2501_s13 = inlined_call_operand.vmem [shape: f32[1,128], index: 13, kind: input, shape index: {}]   ;;  %s2502_s14 = inlined_call_operand.hbm [shape: f32[2,8,128], index: 14, kind: output, shape index: {}]  }
   0x1   :  { %20 = vsyncpa [#allocation8], 0 }
   0x2   :  { %21 = vsyncpa [#allocation11], 0 }
   0x3   :  { %22 = vsyncpa [#allocation14], 0  ;;  %s41_s15 = sshll.u32 %s2489_s1, 4  ;;  %s42_s15 = int_to_ptr.hbm [resolvable:$true] %s41_s15 }
   0x4   :  { %23 = vsyncpa [#allocation6], 0  ;;  %s2173_s16 = smov [#allocation7]   ;;  %s68_s20 = sshll.u32 %s2491_s3, 4  ;;  %s69_s20 = int_to_ptr.hbm [resolvable:$true] %s68_s20 }
   0x5   :  { %s43_s17 = sshll.u32 %s2173_s16, 4  ;;  %s2174_s21 = smov 32   ;;  %s44_s17 = int_to_ptr.vmem [resolvable:$true] %s43_s17 }
   0x6   :  { %s2175_s22 = smov 2   ;;  %s2176_s23 = smov [#allocation10]  }
   0x7   :  { %49 = dma.hbm_to_vmem [thread:$0]  %s42_s15, 64, %s44_s17, [#allocation8], %s2174_s21, %s2174_s21, %s2175_s22  }
   0x8   :  { %s70_s24 = sshll.u32 %s2176_s23, 4  ;;  %s97_s26 = sshll.u32 %s2496_s8, 4  ;;  %s71_s24 = int_to_ptr.vmem [resolvable:$true] %s70_s24  ;;  %s98_s26 = int_to_ptr.hbm [resolvable:$true] %s97_s26 }
   0x9   :  { %73 = dma.hbm_to_vmem [thread:$0]  %s69_s20, 48, %s71_s24, [#allocation11]  }
   0xa   :  { %s2177_s27 = smov [#allocation13]   ;;  %s28_s30 = sshll.u32 %s2488_s0, 4  ;;  %s29_s30 = int_to_ptr.hbm [resolvable:$true] %s28_s30 }
   0xb   :  { %s99_s28 = sshll.u32 %s2177_s27, 4  ;;  %s2178_s16 = smov 128   ;;  %s100_s28 = int_to_ptr.vmem [resolvable:$true] %s99_s28 }
   0xc   :  { %s2179_s18 = smov 8   ;;  %s2180_s15 = smov [#allocation4]  }
   0xd   :  { %105 = dma.hbm_to_vmem [thread:$0]  %s98_s26, 2048, %s100_s28, [#allocation14], %s2178_s16, %s2178_s16, %s2179_s18  }
   0xe   :  { %s30_s17 = sshll.u32 %s2180_s15, 4  ;;  %s54_s8 = sshll.u32 %s2490_s2, 4  ;;  %s31_s17 = int_to_ptr.vmem [resolvable:$true] %s30_s17  ;;  %s55_s8 = int_to_ptr.hbm [resolvable:$true] %s54_s8 }
   0xf   :  { %36 = dma.hbm_to_vmem [thread:$0]  %s29_s30, 256, %s31_s17, [#allocation5], %s2178_s16, %s2178_s16, %s2179_s18  }
  0x10   :  { %s2181_s0 = smov [#allocation9]   ;;  %s78_s1 = sshll.u32 %s2492_s4, 4  ;;  %s79_s1 = int_to_ptr.hbm [resolvable:$true] %s78_s1 }
  0x11   :  { %s56_s22 = sshll.u32 %s2181_s0, 4  ;;  %s2182_s25 = smov 192   ;;  %s57_s22 = int_to_ptr.vmem [resolvable:$true] %s56_s22 }
  0x12   :  { %s2183_s26 = smov 12   ;;  %s2184_s27 = smov [#allocation12]  }
  0x13   :  { %62 = dma.hbm_to_vmem [thread:$0]  %s55_s8, 3072, %s57_s22, [#allocation8], %s2182_s25, %s2182_s25, %s2183_s26  }
  0x14   :  { %s80_s28 = sshll.u32 %s2184_s27, 4  ;;  %s2185_s2 = smov 64   ;;  %s81_s28 = int_to_ptr.vmem [resolvable:$true] %s80_s28 }
  0x15   :  { %s2186_s29 = smov 4   ;;  %s112_s15 = sshll.u32 %s2498_s10, 4  ;;  %s113_s15 = int_to_ptr.hbm [resolvable:$true] %s112_s15 }
  0x16   :  { %86 = dma.hbm_to_vmem [thread:$0]  %s79_s1, 1024, %s81_s28, [#allocation11], %s2185_s2, %s2185_s2, %s2186_s29  }
  0x17   :  { %s2187_s17 = smov [#allocation15]  }
  0x18   :  { %s114_s19 = sshll.u32 %s2187_s17, 4  ;;  %s115_s19 = int_to_ptr.vmem [resolvable:$true] %s114_s19 }
  0x19   :  { %120 = dma.hbm_to_vmem [thread:$0]  %s113_s15, 2048, %s115_s19, [#allocation14], %s2185_s2, %s2185_s2, %s2186_s29  }
  0x1a   :  { %2163 = dma.done.wait [#allocation5], 256  }
  0x1b   :  { %2164 = vsyncadd [#allocation5], 4294967040 }
  0x1c   :  { %2165 = dma.done.wait [#allocation8], 3136  }
  0x1d   :  { %2166 = vsyncadd [#allocation8], 4294964160 }
  0x1e   :  { %2167 = dma.done.wait [#allocation11], 1072  }
  0x1f   :  { %2168 = vsyncadd [#allocation11], 4294966224 }
  0x20   :  { %2169 = dma.done.wait [#allocation14], 4096  }
  0x21   :  { %2170 = vsyncadd [#allocation14], 4294963200  ;;  %v1605_v0 = vld [vmem:[#allocation9 + $0xa8] sm:$0xf]  ;;  %v1817_v1 = vld [vmem:[#allocation9 + $0xb0] sm:$0xf0] }
  0x22   :  { %v1816_v2 = vld [vmem:[#allocation9 + $0xac] sm:$0xf]  ;;  %v1606_v3 = vor.u32 %v1817_v1, %v1605_v0  ;;  %v1607_v4 = vld [vmem:[#allocation9 + $0xb4] sm:$0xf0]  ;;  %v1613_v5 = vld [vmem:[#allocation9 + $0xb0] sm:$0xf] }
  0x23   :  { %v1818_v6 = vld [vmem:[#allocation9 + $0xb8] sm:$0xf0]  ;;  %v1610_v7 = vor.u32 %v1816_v2, %v1607_v4  ;;  %v1593_v9 = vld [vmem:[#allocation9 + $0x90] sm:$0xf]  ;;  %v1813_v11 = vld [vmem:[#allocation9 + $0x94] sm:$0xf] }
  0x24   :  { %v1614_v8 = vor.u32 %v1818_v6, %v1613_v5  ;;  %v1814_v10 = vld [vmem:[#allocation9 + $0x98] sm:$0xf0]  ;;  %334 = vmatpush.bf16.msra.mxu0 %v1606_v3  ;;  %v1595_v13 = vld [vmem:[#allocation9 + $0x9c] sm:$0xf0]  ;;  %v1601_v14 = vld [vmem:[#allocation9 + $0x98] sm:$0xf] }
  0x25   :  { %v1594_v12 = vor.u32 %v1814_v10, %v1593_v9  ;;  %v1815_v15 = vld [vmem:[#allocation9 + $0xa0] sm:$0xf0]  ;;  %348 = vmatpush.bf16.msra.mxu1 %v1610_v7  ;;  %v1598_v16 = vor.u32 %v1813_v11, %v1595_v13  ;;  %v1581_v18 = vld [vmem:[#allocation9 + $0x78] sm:$0xf]  ;;  %v1810_v20 = vld [vmem:[#allocation9 + $0x7c] sm:$0xf] }
  0x26   :  { %362 = vmatpush.bf16.msra.mxu2 %v1614_v8  ;;  %v1602_v17 = vor.u32 %v1815_v15, %v1601_v14  ;;  %v1811_v19 = vld [vmem:[#allocation9 + $0x80] sm:$0xf0]  ;;  %v1583_v21 = vld [vmem:[#allocation9 + $0x84] sm:$0xf0]  ;;  %v1589_v22 = vld [vmem:[#allocation9 + $0x80] sm:$0xf] }
  0x27   :  { %v1812_v23 = vld [vmem:[#allocation9 + $0x88] sm:$0xf0]  ;;  %v1582_v24 = vor.u32 %v1811_v19, %v1581_v18  ;;  %v1586_v25 = vor.u32 %v1810_v20, %v1583_v21  ;;  %v1569_v27 = vld [vmem:[#allocation9 + $0x60] sm:$0xf]  ;;  %v1807_v29 = vld [vmem:[#allocation9 + $0x64] sm:$0xf] }
  0x28   :  { %335 = vmatpush.bf16.msra.mxu0 %v1594_v12  ;;  %v1590_v26 = vor.u32 %v1812_v23, %v1589_v22  ;;  %v1808_v28 = vld [vmem:[#allocation9 + $0x68] sm:$0xf0]  ;;  %v1571_v30 = vld [vmem:[#allocation9 + $0x6c] sm:$0xf0]  ;;  %v1577_v31 = vld [vmem:[#allocation9 + $0x68] sm:$0xf] }
  0x29   :  { %349 = vmatpush.bf16.msra.mxu1 %v1598_v16  ;;  %v1809_v32 = vld [vmem:[#allocation9 + $0x70] sm:$0xf0]  ;;  %v1570_v33 = vor.u32 %v1808_v28, %v1569_v27  ;;  %v1574_v34 = vor.u32 %v1807_v29, %v1571_v30  ;;  %v1557_v36 = vld [vmem:[#allocation9 + $0x48] sm:$0xf]  ;;  %v1804_v38 = vld [vmem:[#allocation9 + $0x4c] sm:$0xf] }
  0x2a   :  { %363 = vmatpush.bf16.msra.mxu2 %v1602_v17  ;;  %v1578_v35 = vor.u32 %v1809_v32, %v1577_v31  ;;  %v1805_v37 = vld [vmem:[#allocation9 + $0x50] sm:$0xf0]  ;;  %v1559_v39 = vld [vmem:[#allocation9 + $0x54] sm:$0xf0]  ;;  %v1565_v40 = vld [vmem:[#allocation9 + $0x50] sm:$0xf] }
  0x2b   :  { %v1806_v41 = vld [vmem:[#allocation9 + $0x58] sm:$0xf0]  ;;  %v1558_v42 = vor.u32 %v1805_v37, %v1557_v36  ;;  %v1545_v43 = vld [vmem:[#allocation9 + $0x30] sm:$0xf]  ;;  %v1562_v45 = vor.u32 %v1804_v38, %v1559_v39  ;;  %v1801_v47 = vld [vmem:[#allocation9 + $0x34] sm:$0xf] }
  0x2c   :  { %336 = vmatpush.bf16.msra.mxu0 %v1582_v24  ;;  %v1802_v44 = vld [vmem:[#allocation9 + $0x38] sm:$0xf0]  ;;  %v1566_v46 = vor.u32 %v1806_v41, %v1565_v40  ;;  %v1547_v48 = vld [vmem:[#allocation9 + $0x3c] sm:$0xf0]  ;;  %v1553_v49 = vld [vmem:[#allocation9 + $0x38] sm:$0xf] }
  0x2d   :  { %350 = vmatpush.bf16.msra.mxu1 %v1586_v25  ;;  %v1803_v50 = vld [vmem:[#allocation9 + $0x40] sm:$0xf0]  ;;  %v1546_v51 = vor.u32 %v1802_v44, %v1545_v43  ;;  %v2299_v52 = vld [vmem:[#allocation4] sm:$0xff]  ;;  %v2301_v53 = vld [vmem:[#allocation4 + $0x8] sm:$0xff]  ;;  %v1550_v54 = vor.u32 %v1801_v47, %v1547_v48  ;;  %s2188_s4 = smov 96   ;;  %vm398_vm0 = vcmask 261120  }
  0x2e   :  { %364 = vmatpush.bf16.msra.mxu2 %v1590_v26  ;;  %v1554_v55 = vor.u32 %v1803_v50, %v1553_v49  ;;  %v1533_v56 = vld [vmem:[#allocation9 + $0x18] sm:$0xf]  ;;  %v1799_v57 = vld [vmem:[#allocation9 + $0x20] sm:$0xf0]  ;;  %v1798_v58 = vld [vmem:[#allocation9 + $0x1c] sm:$0xf]  ;;  %v158_v62 = vpack.c.bf16 %v2299_v52, %v2299_v52  ;;  %v159_v63 = vpack.c.bf16 %v2301_v53, %v2301_v53 }
  0x2f   :  { %v1535_v59 = vld [vmem:[#allocation9 + $0x24] sm:$0xf0]  ;;  %v1541_v60 = vld [vmem:[#allocation9 + $0x20] sm:$0xf]  ;;  %v1800_v61 = vld [vmem:[#allocation9 + $0x28] sm:$0xf0]  ;;  %v1534_v0 = vor.u32 %v1799_v57, %v1533_v56 }
  0x30   :  { %337 = vmatpush.bf16.msra.mxu0 %v1570_v33  ;;  %v1538_v1 = vor.u32 %v1798_v58, %v1535_v59  ;;  %v1542_v2 = vor.u32 %v1800_v61, %v1541_v60  ;;  %v1521_v3 = vld [vmem:[#allocation9] sm:$0xf]  ;;  %v1796_v4 = vld [vmem:[#allocation9 + $0x8] sm:$0xf0]  ;;  %v1795_v5 = vld [vmem:[#allocation9 + $0x4] sm:$0xf]  ;;  %v202_v9 = vunpack.c.l.b16 %v158_v62  ;;  %v203_v10 = vunpack.c.l.b16 %v159_v63 }
  0x31   :  { %351 = vmatpush.bf16.msra.mxu1 %v1574_v34  ;;  %v1523_v6 = vld [vmem:[#allocation9 + $0xc] sm:$0xf0]  ;;  %v1529_v7 = vld [vmem:[#allocation9 + $0x8] sm:$0xf]  ;;  %v1797_v8 = vld [vmem:[#allocation9 + $0x10] sm:$0xf0]  ;;  %v1522_v11 = vor.u32 %v1796_v4, %v1521_v3 }
  0x32   :  { %365 = vmatpush.bf16.msra.mxu2 %v1578_v35  ;;  %v1526_v12 = vor.u32 %v1795_v5, %v1523_v6  ;;  %v1530_v13 = vor.u32 %v1797_v8, %v1529_v7  ;;  %v204_v14 = vpack.c.b16 %v203_v10, %v202_v9  ;;  %v192_v15 = vld [vmem:[#allocation10] sm:$0x7]  ;;  %vm467_vm1 = vcmask 1043456   ;;  %v1902_v60 = vld [vmem:[#allocation7] sm:$0xf]   ;;  %s2190_s25 = smov [#allocation16]  }
  0x33   :  { %v194_v16 = vperm.slane %v192_v15, 0  ;;  %v195_v17 = vperm.slane %v192_v15, 1  ;;  %v196_v23 = vperm.slane %v192_v15, 2  ;;  %v1903_v61 = vunpack.c.0.s8 %v1902_v60  ;;  %s1503_s28 = sshll.u32 %s2502_s14, 4  ;;  %s1504_s28 = int_to_ptr.hbm [resolvable:$true] %s1503_s28 }
  0x34   :  { %338 = vmatpush.bf16.msra.mxu0 %v1558_v42  ;;  %vm439_vm3 = vcmask 64512  }
  0x35   :  { %352 = vmatpush.bf16.msra.mxu1 %v1562_v45  ;;  %v2336_v62 = vcvt.s32.f32 %v1903_v61 }
  0x36   :  { %366 = vmatpush.bf16.msra.mxu2 %v1566_v46 }
  0x37   :  { %vm390_vm2 = vcmp.ne.f32.partialorder %v2336_v62, 0.0 }
  0x38   :  { %339 = vmatpush.bf16.msra.mxu0 %v1546_v51 }
  0x39   :  { %353 = vmatpush.bf16.msra.mxu1 %v1550_v54 }
  0x3a   :  { %367 = vmatpush.bf16.msra.mxu2 %v1554_v55 }
  0x3c   :  { %340 = vmatpush.bf16.msra.mxu0 %v1534_v0 }
  0x3d   :  { %354 = vmatpush.bf16.msra.mxu1 %v1538_v1 }
  0x3e   :  { %368 = vmatpush.bf16.msra.mxu2 %v1542_v2  ;;  %v1904_v2 = vunpack.c.1.s8 %v1902_v60 }
  0x40   :  { %341 = vmatpush.bf16.msra.mxu0 %v1522_v11  ;;  %v2342_v4 = vcvt.s32.f32 %v1904_v2  ;;  %v1820_v2 = vld [vmem:[#allocation12 + $0x8] sm:$0xff] }
  0x41   :  { %355 = vmatpush.bf16.msra.mxu1 %v1526_v12 }
  0x42   :  { %369 = vmatpush.bf16.msra.mxu2 %v1530_v13  ;;  %vm391_vm4 = vcmp.ne.f32.partialorder %v2342_v4, 0.0 }
  0x43   :  { %342 = vmatmul.bf16.vlgmr.msra.gmra.mxu0 %v204_v14 }
  0x44   :  { %356 = vmatmul.bf16.vlgmr.msra.gmra.mxu1 %v204_v14 }
  0x45   :  { %370 = vmatmul.bf16.vlgmr.msra.gmra.mxu2 %v204_v14  ;;  %529 = vmatpush.bf16.msrb.mxu1 %v1820_v2 }
  0xc0   :  { %v343_v18 = vpop.f32.mrf.mxu0 }
  0xc1   :  { %v344_v19 = vadd.f32 %v343_v18, %v194_v16  ;;  %v357_v20 = vpop.f32.mrf.mxu1 }
  0xc2   :  { %v358_v21 = vadd.f32 %v357_v20, %v195_v17 }
  0xc4   :  { %v376_v22 = vpack.c.bf16 %v358_v21, %v344_v19 }
  0xc6   :  { %380 = vst [vmem:[#allocation2] sm:$0xff] %v376_v22  ;;  %v1862_v24 = vunpack.c.h.b16 %v376_v22  ;;  %v1861_v34 = vunpack.c.l.b16 %v376_v22 }
  0xc8   :  { %v371_v25 = vpop.f32.mrf.mxu2  ;;  %v345_v27 = vpop.f32.mrf.mxu0  ;;  %v2307_v28 = vpack.c.b16 %v1862_v24, %v1862_v24  ;;  %v2312_v39 = vpack.c.b16 %v1861_v34, %v1861_v34 }
  0xc9   :  { %v372_v26 = vadd.f32 %v371_v25, %v196_v23  ;;  %v346_v29 = vadd.f32 %v345_v27, %v194_v16  ;;  %v359_v30 = vpop.f32.mrf.mxu1 }
  0xca   :  { %v360_v32 = vadd.f32 %v359_v30, %v195_v17  ;;  %553 = vrot.lane.b32.xlu0 %v2307_v28, %s2188_s4 }
  0xcb   :  { %v377_v31 = vpack.c.bf16 %v372_v26, %v372_v26 }
  0xcc   :  { %v378_v33 = vpack.c.bf16 %v360_v32, %v346_v29 }
  0xcd   :  { %381 = vst [vmem:[#allocation2 + $0x8] sm:$0xf] %v377_v31  ;;  %v394_v35 = vld [vmem:[#allocation2 + $0x4] sm:$0xf]  ;;  %v392_v41 = vld [vmem:[#allocation2] sm:$0xf] }
  0xce   :  { %382 = vst [vmem:[#allocation2 + $0xc] sm:$0xff] %v378_v33  ;;  %v403_v36 = vsel %vm398_vm0, %v394_v35, 0 }
  0xcf   :  { %412 = vmatpush.bf16.xpose.msra.mxu3 %v403_v36 }
  0xd0   :  { %v373_v37 = vpop.f32.mrf.mxu2 }
  0xd1   :  { %v374_v38 = vadd.f32 %v373_v37, %v196_v23 }
  0xd2   :  { %548 = vrot.lane.b32.xlu0 %v2312_v39, %s2188_s4 }
  0xd3   :  { %v379_v40 = vpack.c.bf16 %v374_v38, %v374_v38 }
  0xd4   :  { %v396_v51 = vld [vmem:[#allocation2 + $0x8] sm:$0xf] }
  0xd5   :  { %383 = vst [vmem:[#allocation2 + $0x14] sm:$0xf] %v379_v40  ;;  %v395_v42 = vld [vmem:[#allocation2 + $0x10] sm:$0xf]  ;;  %v1895_v47 = vld [vmem:[#allocation2 + $0x8] sm:$0xff]   ;;  %v469_v54 = vsel %vm467_vm1, %v396_v51, 0 }
  0xd6   :  { %1615 = vmatmul.msk.bf16.vlgmr.msra.gmra.mxu3 %vm398_vm0, %v392_v41  ;;  %v422_v43 = vsel %vm398_vm0, %v395_v42, 0  ;;  %v1866_v48 = vunpack.c.h.b16 %v1895_v47  ;;  %v393_v49 = vld [vmem:[#allocation2 + $0xc] sm:$0xf]  ;;  %v1865_v20 = vunpack.c.l.b16 %v1895_v47 }
  0xd7   :  { %431 = vmatpush.bf16.xpose.msrb.mxu3 %v422_v43 }
  0xd8   :  { %v2326_v50 = vpack.c.b16 %v1866_v48, %v1866_v48  ;;  %v2353_v21 = vpack.c.b16 %v1865_v20, %v1865_v20 }
  0xdc   :  { %v2318_v44 = vld [vmem:[#allocation2 + $0x10] sm:$0xff]  }
  0xdd   :  { %v1869_v45 = vunpack.c.l.b16 %v2318_v44  ;;  %v397_v9 = vld [vmem:[#allocation2 + $0x14] sm:$0xf] }
  0xde   :  { %v488_v10 = vsel %vm467_vm1, %v397_v9, 0 }
  0xdf   :  { %v2321_v46 = vpack.c.b16 %v1869_v45, %v1869_v45  ;;  %478 = vmatpush.bf16.msra.mxu3 %v469_v54  ;;  %497 = vmatpush.bf16.msrb.mxu0 %v488_v10 }
  0xe1   :  { %582 = vrot.lane.b32.xlu2 %v2321_v46, %s2188_s4 }
  0xe6   :  { %1616 = vmatmul.msk.bf16.vlgmr.msrb.gmra.mxu3 %vm398_vm0, %v393_v49 }
  0xe9   :  { %577 = vrot.lane.b32.xlu2 %v2326_v50, %s2188_s4 }
  0xf1   :  { %726 = vrot.lane.b32.xlu2 %v2312_v39, %s2185_s2 }
 0x13b   :  { %v583_v55 = vpop.permute.xlu2 %582 }
 0x13c   :  { %v588_v56 = vsel %vm398_vm0, %v583_v55, 0  ;;  %v554_v57 = vpop.permute.xlu0 %553 }
 0x13d   :  { %597 = vmatpush.bf16.xpose.msrb.mxu3 %v588_v56  ;;  %v559_v58 = vsel %vm398_vm0, %v554_v57, 0 }
 0x13e   :  { %568 = vmatpush.bf16.xpose.msrb.mxu2 %v559_v58 }
 0x143   :  { %v578_v27 = vpop.permute.xlu2 %577 }
 0x144   :  { %v549_v59 = vpop.permute.xlu0 %548 }
 0x145   :  { %1628 = vmatmul.msk.bf16.vlgmr.msrb.gmra.mxu2 %vm398_vm0, %v549_v59 }
 0x14b   :  { %v727_v29 = vpop.permute.xlu2 %726 }
 0x159   :  { %v414_v63 = vpop.f32.mrf.mxu3 }
 0x15a   :  { %v437_v0 = vsel %vm390_vm2, %v414_v63, -10000.0 }
 0x15b   :  { %v440_v1 = vsel %vm439_vm3, %v437_v0, -inf }
 0x15c   :  { %441 = vmax.xlane.f32.xlu1 %v440_v1 }
 0x161   :  { %v416_v3 = vpop.f32.mrf.mxu3 }
 0x169   :  { %v433_v5 = vpop.f32.mrf.mxu3 }
 0x16a   :  { %v438_v6 = vsel %vm391_vm4, %v433_v5, -10000.0  ;;  %v1819_v5 = vld [vmem:[#allocation12] sm:$0xff] }
 0x16b   :  { %v443_v7 = vsel %vm439_vm3, %v438_v6, -inf  ;;  %530 = vmatpush.bf16.msrb.mxu1 %v1819_v5 }
 0x16c   :  { %444 = vmax.xlane.f32.xlu0 %v443_v7  ;;  %v1870_v7 = vunpack.c.h.b16 %v2318_v44 }
 0x16e   :  { %v2381_v10 = vpack.c.b16 %v1870_v7, %v1870_v7 }
 0x171   :  { %v435_v8 = vpop.f32.mrf.mxu3 }
 0x1c8   :  { %v570_v11 = vpop.f32.mrf.mxu2 }
 0x1c9   :  { %v603_v12 = vsel %vm390_vm2, %v570_v11, -10000.0 }
 0x1ca   :  { %v605_v13 = vsel %vm439_vm3, %v603_v12, -inf }
 0x1cb   :  { %606 = vmax.xlane.f32.xlu2 %v605_v13 }
 0x1cf   :  { %v442_v14 = vpop.xlane.xlu1 %441 }
 0x1d0   :  { %v446_v15 = vsub.f32 %v437_v0, %v442_v14  ;;  %v572_v16 = vpop.f32.mrf.mxu2 }
 0x1d2   :  { %v448_v17 = vmul.f32 1.442695, %v446_v15 }
 0x1d4   :  { %1929 = vpow2.f32 %v448_v17 }
 0x1da   :  { %v1930_v18 = vpop.eup %1929 }
 0x1db   :  { %v452_v19 = vsel %vm439_vm3, %v1930_v18, 0.0 }
 0x1dc   :  { %453 = vadd.xlane.f32.xlu1 %v452_v19 }
 0x1df   :  { %v445_v22 = vpop.xlane.xlu0 %444 }
 0x1e0   :  { %v447_v23 = vsub.f32 %v438_v6, %v445_v22 }
 0x1e2   :  { %v450_v24 = vmul.f32 1.442695, %v447_v23 }
 0x1e3   :  { %632 = vrot.lane.b32.xlu2 %v2353_v21, %s2188_s4 }
 0x1e4   :  { %1931 = vpow2.f32 %v450_v24 }
 0x1ea   :  { %v1932_v25 = vpop.eup %1931 }
 0x1eb   :  { %v455_v26 = vsel %vm439_vm3, %v1932_v25, 0.0 }
 0x1f5   :  { %731 = vrot.lane.b32.xlu1 %v2307_v28, %s2185_s2 }
 0x21f   :  { %456 = vadd.xlane.f32.xlu1 %v455_v26 }
 0x238   :  { %755 = vrot.lane.b32.xlu1 %v2326_v50, %s2185_s2 }
 0x23e   :  { %v607_v30 = vpop.xlane.xlu2 %606 }
 0x23f   :  { %v611_v31 = vsub.f32 %v603_v12, %v607_v30 }
 0x241   :  { %v613_v32 = vmul.f32 1.442695, %v611_v31 }
 0x243   :  { %1933 = vpow2.f32 %v613_v32 }
 0x246   :  { %v633_v33 = vpop.permute.xlu2 %632 }
 0x247   :  { %v638_v34 = vsel %vm467_vm1, %v633_v33, 0 }
 0x248   :  { %647 = vmatpush.bf16.msra.mxu0 %v638_v34 }
 0x249   :  { %v1934_v35 = vpop.eup %1933 }
 0x24a   :  { %v617_v36 = vsel %vm439_vm3, %v1934_v35, 0.0 }
 0x24b   :  { %618 = vadd.xlane.f32.xlu0 %v617_v36 }
 0x24f   :  { %v454_v37 = vpop.xlane.xlu1 %453 }
 0x250   :  { %1935 = vrcp.f32 %v454_v37 }
 0x256   :  { %v1936_v38 = vpop.eup %1935 }
 0x257   :  { %v460_v40 = vmul.f32 %v1936_v38, %v1930_v18 }
 0x259   :  { %v462_v41 = vpack.c.bf16 %v460_v40, %v460_v40 }
 0x25b   :  { %1617 = vmatmul.msk.bf16.vlgmr.msra.gmra.mxu3 %vm439_vm3, %v462_v41 }
 0x25f   :  { %760 = vrot.lane.b32.xlu0 %v2321_v46, %s2185_s2 }
 0x267   :  { %v732_v42 = vpop.permute.xlu1 %731 }
 0x268   :  { %v737_v43 = vsel %vm398_vm0, %v732_v42, 0 }
 0x269   :  { %746 = vmatpush.bf16.xpose.msra.mxu3 %v737_v43  ;;  %v1822_v43 = vld [vmem:[#allocation12 + $0x18] sm:$0xff] }
 0x26a   :  { %703 = vmatpush.bf16.msra.mxu2 %v1822_v43 }
 0x26b   :  { %1629 = vmatmul.msk.bf16.vlgmr.msrb.gmra.mxu3 %vm398_vm0, %v578_v27 }
 0x27b   :  { %1641 = vmatmul.msk.bf16.vlgmr.msra.gmra.mxu3 %vm398_vm0, %v727_v29 }
 0x292   :  { %v457_v45 = vpop.xlane.xlu1 %456 }
 0x293   :  { %1937 = vrcp.f32 %v457_v45  ;;  %v1821_v45 = vld [vmem:[#allocation12 + $0x10] sm:$0xff] }
 0x294   :  { %704 = vmatpush.bf16.msra.mxu2 %v1821_v45 }
 0x299   :  { %v1938_v47 = vpop.eup %1937 }
 0x29a   :  { %v461_v48 = vmul.f32 %v1938_v47, %v1932_v25 }
 0x29c   :  { %v463_v49 = vpack.c.bf16 %v461_v48, %v461_v48 }
 0x29e   :  { %1618 = vmatmul.msk.bf16.vlgmr.msrb.gmra.mxu0 %vm439_vm3, %v463_v49 }
 0x2aa   :  { %v756_v59 = vpop.permute.xlu1 %755 }
 0x2be   :  { %v619_v51 = vpop.xlane.xlu0 %618 }
 0x2bf   :  { %1939 = vrcp.f32 %v619_v51 }
 0x2c5   :  { %v1940_v54 = vpop.eup %1939 }
 0x2c6   :  { %v625_v55 = vmul.f32 %v1940_v54, %v1934_v35 }
 0x2c8   :  { %v627_v56 = vpack.c.bf16 %v625_v55, %v625_v55 }
 0x2ca   :  { %1630 = vmatmul.msk.bf16.vlgmr.msra.gmra.mxu0 %vm439_vm3, %v627_v56 }
 0x2d1   :  { %v761_v57 = vpop.permute.xlu0 %760 }
 0x2d2   :  { %v766_v58 = vsel %vm398_vm0, %v761_v57, 0 }
 0x2d3   :  { %775 = vmatpush.bf16.xpose.msrb.mxu0 %v766_v58 }
 0x2da   :  { %1642 = vmatmul.msk.bf16.vlgmr.msrb.gmra.mxu0 %vm398_vm0, %v756_v59 }
 0x2de   :  { %v480_v60 = vpop.f32.mrf.mxu3 }
 0x2e6   :  { %v482_v61 = vpop.f32.mrf.mxu3 }
 0x2ee   :  { %v599_v63 = vpop.f32.mrf.mxu3 }
 0x2ef   :  { %v604_v0 = vsel %vm391_vm4, %v599_v63, -10000.0 }
 0x2f0   :  { %v608_v1 = vsel %vm439_vm3, %v604_v0, -inf }
 0x2f1   :  { %609 = vmax.xlane.f32.xlu0 %v608_v1 }
 0x2f6   :  { %v601_v3 = vpop.f32.mrf.mxu3 }
 0x2fe   :  { %v748_v6 = vpop.f32.mrf.mxu3 }
 0x2ff   :  { %v781_v8 = vsel %vm390_vm2, %v748_v6, -10000.0 }
 0x300   :  { %v783_v9 = vsel %vm439_vm3, %v781_v8, -inf }
 0x301   :  { %784 = vmax.xlane.f32.xlu2 %v783_v9 }
 0x305   :  { %656 = vrot.lane.b32.xlu0 %v2381_v10, %s2188_s4 }
 0x306   :  { %v750_v11 = vpop.f32.mrf.mxu3 }
 0x30d   :  { %909 = vrot.lane.b32.xlu0 %v2307_v28, %s2174_s21 }
 0x315   :  { %904 = vrot.lane.b32.xlu0 %v2312_v39, %s2174_s21 }
 0x319   :  { %810 = vrot.lane.b32.xlu2 %v2353_v21, %s2185_s2 }
 0x31b   :  { %v499_v44 = vpop.f32.mrf.mxu0 }
 0x31c   :  { %v503_v12 = vpack.c.bf16 %v499_v44, %v480_v60 }
 0x31e   :  { %1627 = vmatmul.msk.bf16.vlgmr.msrb.gmra.mxu1 %vm398_vm0, %v503_v12 }
 0x323   :  { %v501_v13 = vpop.f32.mrf.mxu0 }
 0x347   :  { %v2392_v14 = vpop.f32.mrf.mxu0 }
 0x34f   :  { %v651_v15 = vpop.f32.mrf.mxu0 }
 0x357   :  { %v777_v16 = vpop.f32.mrf.mxu0 }
 0x358   :  { %v782_v17 = vsel %vm391_vm4, %v777_v16, -10000.0 }
 0x359   :  { %v786_v28 = vsel %vm439_vm3, %v782_v17, -inf }
 0x35a   :  { %787 = vmax.xlane.f32.xlu0 %v786_v28 }
 0x35f   :  { %v779_v18 = vpop.f32.mrf.mxu0 }
 0x364   :  { %v610_v39 = vpop.xlane.xlu0 %609 }
 0x365   :  { %v612_v19 = vsub.f32 %v604_v0, %v610_v39 }
 0x367   :  { %v615_v20 = vmul.f32 1.442695, %v612_v19 }
 0x369   :  { %1941 = vpow2.f32 %v615_v20  ;;  %v1824_v20 = vld [vmem:[#allocation12 + $0x28] sm:$0xff] }
 0x36a   :  { %881 = vmatpush.bf16.msrb.mxu3 %v1824_v20 }
 0x36f   :  { %v1942_v22 = vpop.eup %1941 }
 0x370   :  { %v620_v23 = vsel %vm439_vm3, %v1942_v22, 0.0 }
 0x371   :  { %621 = vadd.xlane.f32.xlu1 %v620_v23 }
 0x374   :  { %v785_v24 = vpop.xlane.xlu2 %784 }
 0x375   :  { %v789_v25 = vsub.f32 %v781_v8, %v785_v24 }
 0x377   :  { %v791_v26 = vmul.f32 1.442695, %v789_v25  ;;  %v657_v27 = vpop.permute.xlu0 %656 }
 0x378   :  { %v662_v29 = vsel %vm467_vm1, %v657_v27, 0 }
 0x379   :  { %1943 = vpow2.f32 %v791_v26  ;;  %671 = vmatpush.bf16.msra.mxu1 %v662_v29 }
 0x37c   :  { %v811_v30 = vpop.permute.xlu2 %810 }
 0x37d   :  { %v816_v31 = vsel %vm467_vm1, %v811_v30, 0 }
 0x37e   :  { %825 = vmatpush.bf16.msrb.mxu1 %v816_v31 }
 0x37f   :  { %v1944_v32 = vpop.eup %1943  ;;  %v910_v33 = vpop.permute.xlu0 %909 }
 0x380   :  { %v915_v34 = vsel %vm398_vm0, %v910_v33, 0  ;;  %v795_v35 = vsel %vm439_vm3, %v1944_v32, 0.0 }
 0x381   :  { %924 = vmatpush.bf16.xpose.msra.mxu0 %v915_v34  ;;  %796 = vadd.xlane.f32.xlu2 %v795_v35 }
 0x387   :  { %v905_v36 = vpop.permute.xlu0 %904 }
 0x388   :  { %1654 = vmatmul.msk.bf16.vlgmr.msra.gmra.mxu0 %vm398_vm0, %v905_v36 }
 0x38a   :  { %938 = vrot.lane.b32.xlu1 %v2321_v46, %s2174_s21 }
 0x392   :  { %834 = vrot.lane.b32.xlu1 %v2381_v10, %s2185_s2 }
 0x399   :  { %933 = vrot.lane.b32.xlu2 %v2326_v50, %s2174_s21 }
 0x39b   :  { %v532_v2 = vpop.f32.mrf.mxu1 }
 0x3a3   :  { %v2418_v3 = vpop.f32.mrf.mxu1 }
 0x3cd   :  { %v788_v37 = vpop.xlane.xlu0 %787 }
 0x3ce   :  { %v790_v38 = vsub.f32 %v782_v17, %v788_v37 }
 0x3d0   :  { %v793_v40 = vmul.f32 1.442695, %v790_v38  ;;  %v1826_v38 = vld [vmem:[#allocation12 + $0x38] sm:$0xff] }
 0x3d1   :  { %1059 = vmatpush.bf16.msrb.mxu0 %v1826_v38 }
 0x3d2   :  { %1945 = vpow2.f32 %v793_v40 }
 0x3d8   :  { %v1946_v41 = vpop.eup %1945 }
 0x3d9   :  { %v798_v42 = vsel %vm439_vm3, %v1946_v41, 0.0 }
 0x3da   :  { %799 = vadd.xlane.f32.xlu2 %v798_v42 }
 0x3e4   :  { %v622_v47 = vpop.xlane.xlu1 %621 }
 0x3e5   :  { %1947 = vrcp.f32 %v622_v47 }
 0x3eb   :  { %v1948_v46 = vpop.eup %1947 }
 0x3ec   :  { %v626_v48 = vmul.f32 %v1948_v46, %v1942_v22  ;;  %v1823_v22 = vld [vmem:[#allocation12 + $0x20] sm:$0xff] }
 0x3ed   :  { %882 = vmatpush.bf16.msrb.mxu3 %v1823_v22  ;;  %v1727_v22 = vld [vmem:[#allocation13 + $0x78] sm:$0xf0] }
 0x3ee   :  { %v628_v49 = vpack.c.bf16 %v626_v48, %v626_v48 }
 0x3f0   :  { %1631 = vmatmul.msk.bf16.vlgmr.msra.gmra.mxu1 %vm439_vm3, %v628_v49 }
 0x3f4   :  { %v797_v50 = vpop.xlane.xlu2 %796 }
 0x3f5   :  { %1949 = vrcp.f32 %v797_v50 }
 0x3fb   :  { %v1950_v51 = vpop.eup %1949 }
 0x3fc   :  { %v803_v54 = vmul.f32 %v1950_v51, %v1944_v32  ;;  %v939_v55 = vpop.permute.xlu1 %938  ;;  %v934_v1 = vpop.permute.xlu2 %933 }
 0x3fd   :  { %v944_v56 = vsel %vm398_vm0, %v939_v55, 0 }
 0x3fe   :  { %v805_v57 = vpack.c.bf16 %v803_v54, %v803_v54  ;;  %953 = vmatpush.bf16.xpose.msra.mxu1 %v944_v56  ;;  %v1825_v54 = vld [vmem:[#allocation12 + $0x30] sm:$0xff] }
 0x3ff   :  { %1060 = vmatpush.bf16.msrb.mxu0 %v1825_v54 }
 0x400   :  { %1643 = vmatmul.msk.bf16.vlgmr.msrb.gmra.mxu1 %vm439_vm3, %v805_v57 }
 0x404   :  { %v835_v58 = vpop.permute.xlu1 %834 }
 0x405   :  { %v840_v59 = vsel %vm467_vm1, %v835_v58, 0  ;;  %v926_v60 = vpop.f32.mrf.mxu0  ;;  %v1923_v58 = vld [vmem:[%s2493_s5] ss:$0 sm:$0xff] }
 0x406   :  { %v959_v61 = vsel %vm390_vm2, %v926_v60, -10000.0  ;;  %849 = vmatpush.bf16.msrb.mxu2 %v840_v59 }
 0x407   :  { %v961_v63 = vsel %vm439_vm3, %v959_v61, -inf }
 0x408   :  { %962 = vmax.xlane.f32.xlu1 %v961_v63 }
 0x40d   :  { %v928_v0 = vpop.f32.mrf.mxu0 }
 0x410   :  { %1655 = vmatmul.msk.bf16.vlgmr.msra.gmra.mxu1 %vm398_vm0, %v934_v1 }
 0x44d   :  { %v800_v6 = vpop.xlane.xlu2 %799 }
 0x44e   :  { %1951 = vrcp.f32 %v800_v6 }
 0x454   :  { %v1952_v8 = vpop.eup %1951 }
 0x455   :  { %v804_v9 = vmul.f32 %v1952_v8, %v1946_v41 }
 0x457   :  { %v806_v13 = vpack.c.bf16 %v804_v9, %v804_v9 }
 0x46d   :  { %v673_v5 = vpop.f32.mrf.mxu1 }
 0x46e   :  { %v677_v7 = vpack.c.bf16 %v673_v5, %v2392_v14 }
 0x470   :  { %1640 = vmatmul.msk.bf16.vlgmr.msra.gmra.mxu2 %vm398_vm0, %v677_v7 }
 0x475   :  { %v675_v62 = vpop.f32.mrf.mxu1 }
 0x476   :  { %v2189_v62 = vmov 128.0  }
 0x47b   :  { %v963_v11 = vpop.xlane.xlu1 %962 }
 0x47c   :  { %v967_v44 = vsub.f32 %v959_v61, %v963_v11 }
 0x47d   :  { %v827_v12 = vpop.f32.mrf.mxu1 }
 0x47e   :  { %v969_v15 = vmul.f32 1.442695, %v967_v44 }
 0x480   :  { %1953 = vpow2.f32 %v969_v15  ;;  %1644 = vmatmul.msk.bf16.vlgmr.msrb.gmra.mxu2 %vm439_vm3, %v806_v13 }
 0x485   :  { %v829_v16 = vpop.f32.mrf.mxu1 }
 0x486   :  { %v1954_v17 = vpop.eup %1953 }
 0x487   :  { %v973_v28 = vsel %vm439_vm3, %v1954_v17, 0.0 }
 0x488   :  { %974 = vadd.xlane.f32.xlu2 %v973_v28 }
 0x48d   :  { %v955_v14 = vpop.f32.mrf.mxu1 }
 0x48e   :  { %v960_v18 = vsel %vm391_vm4, %v955_v14, -10000.0 }
 0x48f   :  { %v964_v39 = vsel %vm439_vm3, %v960_v18, -inf }
 0x490   :  { %965 = vmax.xlane.f32.xlu0 %v964_v39  ;;  %v1842_v39 = vld [vmem:[#allocation13 + $0x74] sm:$0xf0] }
 0x495   :  { %v957_v19 = vpop.f32.mrf.mxu1 }
 0x496   :  { %v1841_v19 = vld [vmem:[#allocation13 + $0x74] sm:$0xf] }
 0x4a0   :  { %988 = vrot.lane.b32.xlu2 %v2353_v21, %s2174_s21 }
 0x4f3   :  { %v706_v23 = vpop.f32.mrf.mxu2 }
 0x4f4   :  { %v713_v40 = vadd.f32 %v706_v23, %v532_v2  ;;  %v1730_v23 = vor.u32 %v1841_v19, %v1727_v22 }
 0x4fb   :  { %v708_v24 = vpop.f32.mrf.mxu2  ;;  %v975_v25 = vpop.xlane.xlu2 %974 }
 0x4fc   :  { %1955 = vrcp.f32 %v975_v25  ;;  %v714_v63 = vadd.f32 %v708_v24, %v2418_v3  ;;  %v1717_v24 = vld [vmem:[#allocation13 + $0x60] sm:$0xf]  ;;  %v1840_v25 = vld [vmem:[#allocation13 + $0x64] sm:$0xf0] }
 0x502   :  { %v1956_v26 = vpop.eup %1955 }
 0x503   :  { %v981_v27 = vmul.f32 %v1956_v26, %v1954_v17  ;;  %v966_v29 = vpop.xlane.xlu0 %965  ;;  %v851_v4 = vpop.f32.mrf.mxu2  ;;  %v1839_v26 = vld [vmem:[#allocation13 + $0x64] sm:$0xf] }
 0x504   :  { %v968_v30 = vsub.f32 %v960_v18, %v966_v29  ;;  %v855_v31 = vpack.c.bf16 %v851_v4, %v827_v12  ;;  %v989_v32 = vpop.permute.xlu2 %988  ;;  %v1725_v18 = vld [vmem:[#allocation13 + $0x70] sm:$0xf]  ;;  %v1719_v29 = vld [vmem:[#allocation13 + $0x68] sm:$0xf0] }
 0x505   :  { %v983_v33 = vpack.c.bf16 %v981_v27, %v981_v27  ;;  %v994_v34 = vsel %vm467_vm1, %v989_v32, 0  ;;  %v1726_v20 = vor.u32 %v1842_v39, %v1725_v18  ;;  %v1718_v27 = vor.u32 %v1840_v25, %v1717_v24  ;;  %v1837_v32 = vld [vmem:[#allocation13 + $0x54] sm:$0xf]  ;;  %v1856_v18 = vld [vmem:[#allocation15 + $0x68] sm:$0xff] }
 0x506   :  { %v971_v35 = vmul.f32 1.442695, %v968_v30  ;;  %1003 = vmatpush.bf16.msra.mxu2 %v994_v34  ;;  %1653 = vmatmul.msk.bf16.vlgmr.msrb.gmra.mxu3 %vm398_vm0, %v855_v31  ;;  %v1722_v4 = vor.u32 %v1839_v26, %v1719_v29  ;;  %v1709_v30 = vld [vmem:[#allocation13 + $0x50] sm:$0xf]  ;;  %v1838_v31 = vld [vmem:[#allocation13 + $0x54] sm:$0xf0] }
 0x507   :  { %1247 = vmatpush.bf16.msrb.mxu1 %v1726_v20  ;;  %v1711_v34 = vld [vmem:[#allocation13 + $0x58] sm:$0xf0]  ;;  %v1847_v20 = vld [vmem:[#allocation15 + $0x20] sm:$0xff] }
 0x508   :  { %1957 = vpow2.f32 %v971_v35  ;;  %v1714_v35 = vor.u32 %v1837_v32, %v1711_v34 }
 0x509   :  { %1656 = vmatmul.msk.bf16.vlgmr.msra.gmra.mxu2 %vm439_vm3, %v983_v33  ;;  %v1710_v33 = vor.u32 %v1838_v31, %v1709_v30  ;;  %v1924_v31 = vld [vmem:[%s2494_s6] ss:$0 sm:$0xff] }
 0x50a   :  { %1261 = vmatpush.bf16.msrb.mxu2 %v1730_v23 }
 0x50b   :  { %v853_v21 = vpop.f32.mrf.mxu2  ;;  %1248 = vmatpush.bf16.msrb.mxu1 %v1718_v27 }
 0x50c   :  { %v1701_v21 = vld [vmem:[#allocation13 + $0x40] sm:$0xf] }
 0x50e   :  { %v1958_v36 = vpop.eup %1957  ;;  %1262 = vmatpush.bf16.msrb.mxu2 %v1722_v4 }
 0x50f   :  { %v976_v37 = vsel %vm439_vm3, %v1958_v36, 0.0  ;;  %1249 = vmatpush.bf16.msrb.mxu1 %v1710_v33 }
 0x510   :  { %977 = vadd.xlane.f32.xlu0 %v976_v37  ;;  %v1835_v37 = vld [vmem:[#allocation13 + $0x44] sm:$0xf] }
 0x512   :  { %1263 = vmatpush.bf16.msrb.mxu2 %v1714_v35 }
 0x524   :  { %1012 = vrot.lane.b32.xlu0 %v2381_v10, %s2174_s21 }
 0x583   :  { %v978_v41 = vpop.xlane.xlu0 %977 }
 0x584   :  { %1959 = vrcp.f32 %v978_v41 }
 0x585   :  { %1961 = vrcp.f32 %v2189_v62 }
 0x589   :  { %v884_v42 = vpop.f32.mrf.mxu3 }
 0x58a   :  { %v891_v43 = vadd.f32 %v884_v42, %v713_v40  ;;  %v1960_v47 = vpop.eup %1959  ;;  %v1703_v40 = vld [vmem:[#allocation13 + $0x48] sm:$0xf0]  ;;  %v1693_v42 = vld [vmem:[#allocation13 + $0x30] sm:$0xf] }
 0x58b   :  { %v982_v48 = vmul.f32 %v1960_v47, %v1958_v36  ;;  %v1962_v8 = vpop.eup %1961  ;;  %v1836_v36 = vld [vmem:[#allocation13 + $0x44] sm:$0xf0]  ;;  %v1706_v41 = vor.u32 %v1835_v37, %v1703_v40 }
 0x58c   :  { %v1005_v45 = vpop.f32.mrf.mxu2  ;;  %v1090_v9 = vmul.f32 128.0, %v1962_v8  ;;  %vm1094_vm5 = vweird.f32 %v1962_v8  ;;  %v1702_v38 = vor.u32 %v1836_v36, %v1701_v21  ;;  %v1925_v21 = vld [vmem:[%s2495_s7] ss:$0 sm:$0xff] }
 0x58d   :  { %v984_v51 = vpack.c.bf16 %v982_v48, %v982_v48  ;;  %1264 = vmatpush.bf16.msrb.mxu2 %v1706_v41  ;;  %v1855_v41 = vld [vmem:[#allocation15 + $0x60] sm:$0xff] }
 0x58e   :  { %v1091_v11 = vsub.f32 1.0, %v1090_v9  ;;  %1250 = vmatpush.bf16.msrb.mxu1 %v1702_v38  ;;  %v1850_v9 = vld [vmem:[#allocation15 + $0x38] sm:$0xff] }
 0x590   :  { %v1092_v44 = vmul.f32 %v1962_v8, %v1091_v11  ;;  %v1858_v11 = vld [vmem:[#allocation15 + $0x78] sm:$0xff] }
 0x591   :  { %v886_v10 = vpop.f32.mrf.mxu3  ;;  %1427 = vmatpush.bf16.msra.mxu0 %v1858_v11 }
 0x592   :  { %v892_v1 = vadd.f32 %v886_v10, %v714_v63  ;;  %v1093_v12 = vadd.f32 %v1962_v8, %v1092_v44  ;;  %v1687_v10 = vld [vmem:[#allocation13 + $0x28] sm:$0xf0]  ;;  %v1828_v63 = vld [vmem:[#allocation13 + $0x4] sm:$0xf0] }
 0x594   :  { %v1007_v46 = vpop.f32.mrf.mxu2  ;;  %v2444_v13 = vsel %vm1094_vm5, %v1962_v8, %v1093_v12 }
 0x595   :  { %v1695_v46 = vld [vmem:[#allocation13 + $0x38] sm:$0xf0] }
 0x596   :  { %v1013_v49 = vpop.permute.xlu0 %1012 }
 0x597   :  { %v1018_v50 = vsel %vm467_vm1, %v1013_v49, 0  ;;  %v1685_v49 = vld [vmem:[#allocation13 + $0x20] sm:$0xf] }
 0x598   :  { %1027 = vmatpush.bf16.msra.mxu3 %v1018_v50  ;;  %v1832_v50 = vld [vmem:[#allocation13 + $0x24] sm:$0xf0] }
 0x599   :  { %v1686_v54 = vor.u32 %v1832_v50, %v1685_v49  ;;  %v1161_v49 = vld [vmem:[%s2497_s9] sm:$0x3] }
 0x59b   :  { %1657 = vmatmul.msk.bf16.vlgmr.msra.gmra.mxu3 %vm439_vm3, %v984_v51  ;;  %v1831_v51 = vld [vmem:[#allocation13 + $0x24] sm:$0xf] }
 0x59c   :  { %1413 = vmatpush.bf16.msrb.mxu3 %v1850_v9 }
 0x61e   :  { %v1029_v55 = vpop.f32.mrf.mxu3 }
 0x61f   :  { %v1033_v56 = vpack.c.bf16 %v1029_v55, %v1005_v45  ;;  %v1833_v45 = vld [vmem:[#allocation13 + $0x34] sm:$0xf]  ;;  %v1690_v55 = vor.u32 %v1831_v51, %v1687_v10  ;;  %v1163_v51 = vperm.slane %v1161_v49, 0 }
 0x620   :  { %v1698_v48 = vor.u32 %v1833_v45, %v1695_v46  ;;  %v1853_v45 = vld [vmem:[#allocation15 + $0x50] sm:$0xff]  ;;  %v1852_v46 = vld [vmem:[#allocation15 + $0x48] sm:$0xff] }
 0x621   :  { %1666 = vmatmul.msk.bf16.vlgmr.msrb.gmra.mxu0 %vm398_vm0, %v1033_v56  ;;  %v1677_v56 = vld [vmem:[#allocation13 + $0x10] sm:$0xf] }
 0x622   :  { %1265 = vmatpush.bf16.msrb.mxu2 %v1698_v48  ;;  %v1851_v48 = vld [vmem:[#allocation15 + $0x40] sm:$0xff] }
 0x626   :  { %v1031_v57 = vpop.f32.mrf.mxu3  ;;  %1266 = vmatpush.bf16.msrb.mxu2 %v1690_v55 }
 0x627   :  { %v1830_v57 = vld [vmem:[#allocation13 + $0x14] sm:$0xf0] }
 0x69e   :  { %v1062_v59 = vpop.f32.mrf.mxu0 }
 0x69f   :  { %v1069_v60 = vadd.f32 %v1062_v59, %v891_v43  ;;  %v1834_v43 = vld [vmem:[#allocation13 + $0x34] sm:$0xf0]  ;;  %v1678_v59 = vor.u32 %v1830_v57, %v1677_v56  ;;  %v1164_v56 = vperm.slane %v1161_v49, 1 }
 0x6a0   :  { %v1694_v47 = vor.u32 %v1834_v43, %v1693_v42  ;;  %v1845_v42 = vld [vmem:[#allocation15 + $0x10] sm:$0xff]  ;;  %v1854_v43 = vld [vmem:[#allocation15 + $0x58] sm:$0xff] }
 0x6a1   :  { %v1081_v61 = vadd.f32 %v1923_v58, %v1069_v60  ;;  %v1679_v60 = vld [vmem:[#allocation13 + $0x18] sm:$0xf0] }
 0x6a2   :  { %1251 = vmatpush.bf16.msrb.mxu1 %v1694_v47  ;;  %v1843_v47 = vld [vmem:[#allocation15] sm:$0xff] }
 0x6a3   :  { %v1083_v0 = vadd.f32 %v1081_v61, %v2299_v52  ;;  %v1669_v61 = vld [vmem:[#allocation13] sm:$0xf] }
 0x6a5   :  { %1085 = vadd.xlane.f32.xlu1 %v1083_v0 }
 0x6a6   :  { %v1064_v2 = vpop.f32.mrf.mxu0  ;;  %1252 = vmatpush.bf16.msrb.mxu1 %v1686_v54 }
 0x6a7   :  { %v1070_v5 = vadd.f32 %v1064_v2, %v892_v1  ;;  %v1827_v2 = vld [vmem:[#allocation13 + $0x4] sm:$0xf] }
 0x6a9   :  { %v1082_v6 = vadd.f32 %v1923_v58, %v1070_v5  ;;  %v1829_v58 = vld [vmem:[#allocation13 + $0x14] sm:$0xf]  ;;  %v1671_v5 = vld [vmem:[#allocation13 + $0x8] sm:$0xf0] }
 0x6aa   :  { %v1682_v1 = vor.u32 %v1829_v58, %v1679_v60  ;;  %1253 = vmatpush.bf16.msrb.mxu1 %v1678_v59  ;;  %v1674_v62 = vor.u32 %v1827_v2, %v1671_v5 }
 0x6ab   :  { %v1084_v7 = vadd.f32 %v1082_v6, %v2301_v53 }
 0x6ac   :  { %1267 = vmatpush.bf16.msrb.mxu2 %v1682_v1 }
 0x6ad   :  { %1087 = vadd.xlane.f32.xlu1 %v1084_v7 }
 0x6b0   :  { %1268 = vmatpush.bf16.msrb.mxu2 %v1674_v62 }
 0x718   :  { %v1086_v3 = vpop.xlane.xlu1 %1085 }
 0x719   :  { %v1096_v52 = vmul.f32 %v2444_v13, %v1086_v3  ;;  %v1849_v3 = vld [vmem:[#allocation15 + $0x30] sm:$0xff] }
 0x71a   :  { %1414 = vmatpush.bf16.msrb.mxu3 %v1849_v3 }
 0x71b   :  { %v2447_v15 = vsub.f32 %v1083_v0, %v1096_v52  ;;  %v1857_v52 = vld [vmem:[#allocation15 + $0x70] sm:$0xff] }
 0x71c   :  { %1428 = vmatpush.bf16.msra.mxu0 %v1857_v52 }
 0x71d   :  { %v1100_v16 = vmul.f32 %v2447_v15, %v2447_v15 }
 0x71f   :  { %1102 = vadd.xlane.f32.xlu1 %v1100_v16 }
 0x720   :  { %v1088_v53 = vpop.xlane.xlu1 %1087  ;;  %1429 = vmatpush.bf16.msra.mxu0 %v1856_v18 }
 0x721   :  { %v1097_v17 = vmul.f32 %v2444_v13, %v1088_v53 }
 0x723   :  { %v2452_v28 = vsub.f32 %v1084_v7, %v1097_v17  ;;  %v1670_v7 = vor.u32 %v1828_v63, %v1669_v61 }
 0x724   :  { %1430 = vmatpush.bf16.msra.mxu0 %v1855_v41 }
 0x725   :  { %v1101_v14 = vmul.f32 %v2452_v28, %v2452_v28  ;;  %1254 = vmatpush.bf16.msrb.mxu1 %v1670_v7 }
 0x727   :  { %1104 = vadd.xlane.f32.xlu0 %v1101_v14  ;;  %v1848_v14 = vld [vmem:[#allocation15 + $0x28] sm:$0xff] }
 0x728   :  { %1415 = vmatpush.bf16.msrb.mxu3 %v1848_v14  ;;  %1431 = vmatpush.bf16.msra.mxu0 %v1854_v43 }
 0x72c   :  { %1416 = vmatpush.bf16.msrb.mxu3 %v1847_v20  ;;  %1432 = vmatpush.bf16.msra.mxu0 %v1853_v45 }
 0x730   :  { %1433 = vmatpush.bf16.msra.mxu0 %v1852_v46 }
 0x734   :  { %1434 = vmatpush.bf16.msra.mxu0 %v1851_v48 }
 0x792   :  { %v1103_v0 = vpop.xlane.xlu1 %1102 }
 0x793   :  { %v1106_v6 = vmul.f32 %v1103_v0, %v2444_v13 }
 0x795   :  { %v1108_v8 = vadd.f32 1e-12, %v1106_v6  ;;  %v1926_v6 = vld [vmem:[%s2499_s11] ss:$0 sm:$0xff] }
 0x797   :  { %1963 = vrsqrt.f32 %v1108_v8  ;;  %vm1116_vm7 = vweird.f32 %v1108_v8 }
 0x79a   :  { %v1105_v44 = vpop.xlane.xlu0 %1104 }
 0x79b   :  { %v1107_v12 = vmul.f32 %v1105_v44, %v2444_v13 }
 0x79d   :  { %v1964_v16 = vpop.eup %1963  ;;  %v1109_v53 = vadd.f32 1e-12, %v1107_v12 }
 0x79e   :  { %v1111_v17 = vmul.f32 %v1964_v16, %v1108_v8  ;;  %vm1117_vm6 = vweird.f32 %v1964_v16 }
 0x79f   :  { %1965 = vrsqrt.f32 %v1109_v53  ;;  %vm1118_vm8 = vmor %vm1116_vm7, %vm1117_vm6  ;;  %vm1126_vm10 = vweird.f32 %v1109_v53 }
 0x7a0   :  { %v1112_v39 = vmul.f32 %v1964_v16, %v1111_v17 }
 0x7a2   :  { %v1113_v19 = vmul.f32 0.5, %v1112_v39 }
 0x7a4   :  { %v1114_v22 = vsub.f32 1.5, %v1113_v19 }
 0x7a5   :  { %v1966_v23 = vpop.eup %1965 }
 0x7a6   :  { %v1115_v24 = vmul.f32 %v1964_v16, %v1114_v22  ;;  %v1121_v25 = vmul.f32 %v1966_v23, %v1109_v53  ;;  %vm1127_vm9 = vweird.f32 %v1966_v23 }
 0x7a7   :  { %vm1128_vm11 = vmor %vm1126_vm10, %vm1127_vm9 }
 0x7a8   :  { %v1122_v26 = vmul.f32 %v1966_v23, %v1121_v25  ;;  %v1119_v27 = vsel %vm1118_vm8, %v1964_v16, %v1115_v24 }
 0x7a9   :  { %v1130_v30 = vmul.f32 %v1119_v27, %v2447_v15  ;;  %v1846_v15 = vld [vmem:[#allocation15 + $0x18] sm:$0xff] }
 0x7aa   :  { %v1123_v29 = vmul.f32 0.5, %v1122_v26  ;;  %1417 = vmatpush.bf16.msrb.mxu3 %v1846_v15 }
 0x7ab   :  { %v1136_v35 = vmul.f32 %v1924_v31, %v1130_v30 }
 0x7ac   :  { %v1124_v4 = vsub.f32 1.5, %v1123_v29 }
 0x7ad   :  { %v1142_v37 = vadd.f32 %v1925_v21, %v1136_v35 }
 0x7ae   :  { %v1125_v32 = vmul.f32 %v1966_v23, %v1124_v4  ;;  %1418 = vmatpush.bf16.msrb.mxu3 %v1845_v42 }
 0x7b0   :  { %v1129_v33 = vsel %vm1128_vm11, %v1966_v23, %v1125_v32 }
 0x7b1   :  { %v1131_v34 = vmul.f32 %v1129_v33, %v2452_v28  ;;  %v1844_v28 = vld [vmem:[#allocation15 + $0x8] sm:$0xff] }
 0x7b2   :  { %1419 = vmatpush.bf16.msrb.mxu3 %v1844_v28 }
 0x7b3   :  { %v1137_v36 = vmul.f32 %v1924_v31, %v1131_v34 }
 0x7b5   :  { %v1143_v38 = vadd.f32 %v1925_v21, %v1137_v36  ;;  %v1927_v36 = vld [vmem:[%s2500_s12] ss:$0 sm:$0xff]  ;;  %s1501_s12 = sshll.u32 %s2190_s25, 4  ;;  %s1502_s12 = int_to_ptr.vmem [resolvable:$true] %s1501_s12 }
 0x7b6   :  { %1420 = vmatpush.bf16.msrb.mxu3 %v1843_v47 }
 0x7b7   :  { %v1144_v40 = vpack.c.bf16 %v1143_v38, %v1142_v37 }
 0x7b9   :  { %1255 = vmatmul.bf16.vlgmr.msrb.gmra.mxu1 %v1144_v40  ;;  %1269 = vmatmul.bf16.vlgmr.msrb.gmra.mxu2 %v1144_v40  ;;  %v1928_v40 = vld [vmem:[%s2501_s13] ss:$0 sm:$0xff] }
 0x836   :  { %v1256_v50 = vpop.f32.mrf.mxu1 }
 0x837   :  { %v1257_v10 = vadd.f32 %v1256_v50, %v1163_v51 }
 0x839   :  { %v1275_v58 = vmax.f32 %v1257_v10, 0.0 }
 0x83c   :  { %v1270_v54 = vpop.f32.mrf.mxu2 }
 0x83d   :  { %v1271_v60 = vadd.f32 %v1270_v54, %v1164_v56 }
 0x83e   :  { %v1258_v55 = vpop.f32.mrf.mxu1 }
 0x83f   :  { %v1259_v57 = vadd.f32 %v1258_v55, %v1163_v51  ;;  %v1276_v1 = vmax.f32 %v1271_v60, 0.0 }
 0x841   :  { %v1277_v59 = vmax.f32 %v1259_v57, 0.0 }
 0x843   :  { %v1279_v61 = vpack.c.bf16 %v1277_v59, %v1275_v58 }
 0x844   :  { %v1272_v63 = vpop.f32.mrf.mxu2 }
 0x845   :  { %v1273_v0 = vadd.f32 %v1272_v63, %v1164_v56  ;;  %1421 = vmatmul.bf16.vlgmr.msrb.gmra.mxu3 %v1279_v61 }
 0x847   :  { %v1278_v2 = vmax.f32 %v1273_v0, 0.0 }
 0x849   :  { %v1280_v5 = vpack.c.bf16 %v1278_v2, %v1276_v1 }
 0x84b   :  { %1435 = vmatmul.bf16.vlgmr.msra.gmra.mxu0 %v1280_v5 }
 0x8c8   :  { %v1422_v7 = vpop.f32.mrf.mxu3  ;;  %v1436_v62 = vpop.f32.mrf.mxu0 }
 0x8c9   :  { %v1423_v8 = vadd.f32 %v1926_v6, %v1422_v7 }
 0x8cb   :  { %v1437_v9 = vadd.f32 %v1436_v62, %v1423_v8 }
 0x8cd   :  { %v1441_v11 = vadd.f32 %v1437_v9, %v1142_v37 }
 0x8cf   :  { %1443 = vadd.xlane.f32.xlu2 %v1441_v11 }
 0x8d0   :  { %v1424_v44 = vpop.f32.mrf.mxu3  ;;  %v1438_v3 = vpop.f32.mrf.mxu0 }
 0x8d1   :  { %v1425_v12 = vadd.f32 %v1926_v6, %v1424_v44 }
 0x8d3   :  { %v1439_v52 = vadd.f32 %v1438_v3, %v1425_v12 }
 0x8d5   :  { %v1442_v16 = vadd.f32 %v1439_v52, %v1143_v38 }
 0x8d7   :  { %1445 = vadd.xlane.f32.xlu1 %v1442_v16 }
 0x942   :  { %v1444_v53 = vpop.xlane.xlu2 %1443 }
 0x943   :  { %v1447_v17 = vmul.f32 %v1444_v53, %v2444_v13 }
 0x945   :  { %v1449_v14 = vsub.f32 %v1441_v11, %v1447_v17 }
 0x947   :  { %v1451_v18 = vmul.f32 %v1449_v14, %v1449_v14 }
 0x949   :  { %1453 = vadd.xlane.f32.xlu1 %v1451_v18 }
 0x94a   :  { %v1446_v39 = vpop.xlane.xlu1 %1445 }
 0x94b   :  { %v1448_v19 = vmul.f32 %v1446_v39, %v2444_v13 }
 0x94d   :  { %v1450_v20 = vsub.f32 %v1442_v16, %v1448_v19 }
 0x94f   :  { %v1452_v22 = vmul.f32 %v1450_v20, %v1450_v20 }
 0x951   :  { %1455 = vadd.xlane.f32.xlu1 %v1452_v22 }
 0x9bc   :  { %v1454_v23 = vpop.xlane.xlu1 %1453 }
 0x9bd   :  { %v1457_v24 = vmul.f32 %v1454_v23, %v2444_v13 }
 0x9bf   :  { %v1459_v25 = vadd.f32 1e-12, %v1457_v24 }
 0x9c1   :  { %1967 = vrsqrt.f32 %v1459_v25  ;;  %vm1467_vm13 = vweird.f32 %v1459_v25 }
 0x9c4   :  { %v1456_v26 = vpop.xlane.xlu1 %1455 }
 0x9c5   :  { %v1458_v27 = vmul.f32 %v1456_v26, %v2444_v13 }
 0x9c7   :  { %v1968_v29 = vpop.eup %1967  ;;  %v1460_v4 = vadd.f32 1e-12, %v1458_v27 }
 0x9c8   :  { %v1462_v30 = vmul.f32 %v1968_v29, %v1459_v25  ;;  %vm1468_vm12 = vweird.f32 %v1968_v29 }
 0x9c9   :  { %1969 = vrsqrt.f32 %v1460_v4  ;;  %vm1469_vm14 = vmor %vm1467_vm13, %vm1468_vm12  ;;  %vm1477_vm0 = vweird.f32 %v1460_v4 }
 0x9ca   :  { %v1463_v31 = vmul.f32 %v1968_v29, %v1462_v30 }
 0x9cc   :  { %v1464_v32 = vmul.f32 0.5, %v1463_v31 }
 0x9ce   :  { %v1465_v33 = vsub.f32 1.5, %v1464_v32 }
 0x9cf   :  { %v1970_v34 = vpop.eup %1969 }
 0x9d0   :  { %v1466_v35 = vmul.f32 %v1968_v29, %v1465_v33  ;;  %v1472_v21 = vmul.f32 %v1970_v34, %v1460_v4  ;;  %vm1478_vm15 = vweird.f32 %v1970_v34 }
 0x9d1   :  { %vm1479_vm1 = vmor %vm1477_vm0, %vm1478_vm15 }
 0x9d2   :  { %v1470_v37 = vsel %vm1469_vm14, %v1968_v29, %v1466_v35  ;;  %v1473_v38 = vmul.f32 %v1970_v34, %v1472_v21 }
 0x9d3   :  { %v1481_v13 = vmul.f32 %v1470_v37, %v1449_v14 }
 0x9d4   :  { %v1474_v15 = vmul.f32 0.5, %v1473_v38 }
 0x9d5   :  { %v1487_v41 = vmul.f32 %v1927_v36, %v1481_v13 }
 0x9d6   :  { %v1475_v42 = vsub.f32 1.5, %v1474_v15 }
 0x9d7   :  { %v1493_v43 = vadd.f32 %v1928_v40, %v1487_v41 }
 0x9d8   :  { %v1476_v28 = vmul.f32 %v1970_v34, %v1475_v42 }
 0x9d9   :  { %1495 = vst [vmem:[#allocation16] sm:$0xff] %v1493_v43 }
 0x9da   :  { %v1480_v45 = vsel %vm1479_vm1, %v1970_v34, %v1476_v28 }
 0x9db   :  { %v1482_v47 = vmul.f32 %v1480_v45, %v1450_v20 }
 0x9dd   :  { %v1488_v46 = vmul.f32 %v1927_v36, %v1482_v47 }
 0x9df   :  { %v1494_v48 = vadd.f32 %v1928_v40, %v1488_v46 }
 0x9e1   :  { %1496 = vst [vmem:[#allocation16 + $0x8] sm:$0xff] %v1494_v48 }
 0x9e2   :  { %1509 = dma.vmem_to_hbm [thread:$0]  %s1502_s12, 256, %s1504_s28, [#allocation6], %s2178_s16, %s2178_s16, %s2179_s18  }
 0x9e3   :  { %2171 = dma.done.wait [#allocation6], 256  }
 0x9e4   :  { %2172 = vsyncadd [#allocation6], 4294967040 }
 0x9e5   :  { %1514 = vsyncpa [#allocation5], 1 }
 0x9e6   :  { %1515 = vsyncpa [#allocation8], 1 }
 0x9e7   :  { %1516 = vsyncpa [#allocation11], 1 }
 0x9e8   :  { %1517 = vsyncpa [#allocation14], 1 }
 0x9e9   :  { %1518 = vsyncpa [#allocation6], 1 }

</bundles_post_ra>
